<compile_context>
chip_gen: v7x
topology: tpu7x:2x2x1
jax: 0.10.0
libtpu: 0.0.40
codegen_flags: <defaults>
</compile_context>

<pallas_src>
import functools

import jax
import jax.numpy as jnp
import numpy as np
from jax import lax
from jax.experimental import pallas as pl
from jax.experimental.pallas import tpu as pltpu

EPS = 1e-5             # nn.GroupNorm default eps
SLOPE = 0.01           # LeakyReLU negative_slope
LANE_TILE_MAX = 2048   # max spatial (lane) tile width
VMEM_LIMIT = 32 * 1024 * 1024


# ----------------------------------------------------------------------------
# small helpers
# ----------------------------------------------------------------------------
def round_up(x, m):
    return ((x + m - 1) // m) * m


def pad_axis(a, axis, target):
    if a.shape[axis] == target:
        return a
    pads = [(0, 0)] * a.ndim
    pads[axis] = (0, target - a.shape[axis])
    return jnp.pad(a, pads)


# ----------------------------------------------------------------------------
# Pallas kernels
# ----------------------------------------------------------------------------
def _conv_stats_kernel(cols_ref, w_ref, b_ref, y_ref, mean_ref, rstd_ref,
                       *, l_true, npad):
    """out(C, TL) = W(C, K) @ cols(K, TL) + b ; fused per-channel sum/sumsq.

    Grid = (N, L_tiles); the L_tiles axis is "arbitrary" and mean/rstd outputs
    stay resident across it (accumulator pattern).  Padded spatial lanes hold
    exactly `b` per channel (zero im2col columns), so their contribution to the
    sums is subtracted analytically before computing mean / rstd.
    """
    l = pl.program_id(1)
    b = b_ref[...]                                                  # (C, 1) f32
    y = jnp.dot(w_ref[...], cols_ref[...],
                preferred_element_type=jnp.float32) + b             # (C, TL) f32
    y_ref[...] = y

    @pl.when(l == 0)
    def _init():
        mean_ref[...] = jnp.zeros_like(mean_ref)
        rstd_ref[...] = jnp.zeros_like(rstd_ref)

    mean_ref[...] += jnp.sum(y, axis=-1, keepdims=True)             # running sum
    rstd_ref[...] += jnp.sum(y * y, axis=-1, keepdims=True)         # running sum of squares

    @pl.when(l == pl.num_programs(1) - 1)
    def _finalize():
        s = mean_ref[...] - npad * b
        ss = rstd_ref[...] - npad * (b * b)
        mean = s * (1.0 / l_true)
        var = ss * (1.0 / l_true) - mean * mean
        mean_ref[...] = mean
        rstd_ref[...] = lax.rsqrt(var + EPS)


def _gn_lrelu_kernel(y_ref, mean_ref, rstd_ref, g_ref, b_ref, o_ref):
    """Apply GroupNorm(num_groups=C) affine + LeakyReLU on a lane-dense tile."""
    y = y_ref[...]                                                  # (C, TL) f32
    yn = (y - mean_ref[...]) * (rstd_ref[...] * g_ref[...]) + b_ref[...]
    o_ref[...] = jnp.where(yn >= 0, yn, SLOPE * yn).astype(o_ref.dtype)


def _final_kernel(y2_ref, m2_ref, r2_ref, g2_ref, b2_ref,
                  res_ref, m3_ref, r3_ref, g3_ref, b3_ref, o_ref):
    """out = lrelu( GN2(conv2_out) + GN3(residual) ), tiled over lanes.

    For the non-downsample case the wrapper passes identity GN3 stats/params,
    which reduces the residual term to the raw input.
    """
    y = (y2_ref[...] - m2_ref[...]) * (r2_ref[...] * g2_ref[...]) + b2_ref[...]
    r = (res_ref[...] - m3_ref[...]) * (r3_ref[...] * g3_ref[...]) + b3_ref[...]
    z = y + r
    o_ref[...] = jnp.where(z >= 0, z, SLOPE * z).astype(o_ref.dtype)


# ----------------------------------------------------------------------------
# pallas_call wrappers
# ----------------------------------------------------------------------------
def _params(sem):
    return pltpu.CompilerParams(dimension_semantics=sem,
                                vmem_limit_bytes=VMEM_LIMIT)


def conv_matmul_stats(cols, w_mat, bias, *, tl, l_true):
    """cols: (N, Kp, Lp) bf16, w_mat: (Cp, Kp) bf16, bias: (Cp, 1) f32.

    Returns (y, mean, rstd): y is the bias-added conv output in the lane-dense
    (N, Cp, Lp) f32 layout, mean/rstd are the per-(sample, channel) GroupNorm
    statistics over the true spatial extent l_true.
    """
    N, Kp, Lp = cols.shape
    Cp = w_mat.shape[0]
    n_l = Lp // tl
    kern = functools.partial(_conv_stats_kernel, l_true=l_true, npad=Lp - l_true)
    y, mean, rstd = pl.pallas_call(
        kern,
        grid=(N, n_l),
        in_specs=[
            pl.BlockSpec((None, Kp, tl), lambda n, l: (n, 0, l)),
            pl.BlockSpec((Cp, Kp), lambda n, l: (0, 0)),
            pl.BlockSpec((Cp, 1), lambda n, l: (0, 0)),
        ],
        out_specs=(
            pl.BlockSpec((None, Cp, tl), lambda n, l: (n, 0, l)),
            pl.BlockSpec((None, Cp, 1), lambda n, l: (n, 0, 0)),
            pl.BlockSpec((None, Cp, 1), lambda n, l: (n, 0, 0)),
        ),
        out_shape=(
            jax.ShapeDtypeStruct((N, Cp, Lp), jnp.float32),
            jax.ShapeDtypeStruct((N, Cp, 1), jnp.float32),
            jax.ShapeDtypeStruct((N, Cp, 1), jnp.float32),
        ),
        compiler_params=_params(("parallel", "arbitrary")),
    )(cols, w_mat, bias)
    return y, mean, rstd


def gn_lrelu(y, mean, rstd, gamma, beta, *, tl, out_dtype):
    N, Cp, Lp = y.shape
    n_l = Lp // tl
    return pl.pallas_call(
        _gn_lrelu_kernel,
        grid=(N, n_l),
        in_specs=[
            pl.BlockSpec((None, Cp, tl), lambda n, l: (n, 0, l)),
            pl.BlockSpec((None, Cp, 1), lambda n, l: (n, 0, 0)),
            pl.BlockSpec((None, Cp, 1), lambda n, l: (n, 0, 0)),
            pl.BlockSpec((Cp, 1), lambda n, l: (0, 0)),
            pl.BlockSpec((Cp, 1), lambda n, l: (0, 0)),
        ],
        out_specs=pl.BlockSpec((None, Cp, tl), lambda n, l: (n, 0, l)),
        out_shape=jax.ShapeDtypeStruct((N, Cp, Lp), out_dtype),
        compiler_params=_params(("parallel", "parallel")),
    )(y, mean, rstd, gamma, beta)


def final_fuse(y2, m2, r2, g2, be2, res, m3, r3, g3, be3, *, tl):
    N, Cp, Lp = y2.shape
    n_l = Lp // tl
    spec_tile = pl.BlockSpec((None, Cp, tl), lambda n, l: (n, 0, l))
    spec_stat = pl.BlockSpec((None, Cp, 1), lambda n, l: (n, 0, 0))
    spec_par = pl.BlockSpec((Cp, 1), lambda n, l: (0, 0))
    return pl.pallas_call(
        _final_kernel,
        grid=(N, n_l),
        in_specs=[spec_tile, spec_stat, spec_stat, spec_par, spec_par,
                  spec_tile, spec_stat, spec_stat, spec_par, spec_par],
        out_specs=spec_tile,
        out_shape=jax.ShapeDtypeStruct((N, Cp, Lp), jnp.float32),
        compiler_params=_params(("parallel", "parallel")),
    )(y2, m2, r2, g2, be2, res, m3, r3, g3, be3)


# ----------------------------------------------------------------------------
# Glue: channels-first im2col for 3D conv (FLOPs live in the Pallas matmul)
# ----------------------------------------------------------------------------
def im2col_3d(x, k, stride, pad):
    """x: (N, C, D, H, W) -> cols (N, C*k^3, L) with K index = c*k^3 + tap."""
    N, C, D, H, W = x.shape
    xp = jnp.pad(x, ((0, 0), (0, 0), (pad, pad), (pad, pad), (pad, pad)))
    Do = (D + 2 * pad - k) // stride + 1
    Ho = (H + 2 * pad - k) // stride + 1
    Wo = (W + 2 * pad - k) // stride + 1
    taps = []
    for kd in range(k):
        for kh in range(k):
            for kw in range(k):
                taps.append(xp[:, :, kd:kd + Do * stride:stride,
                                     kh:kh + Ho * stride:stride,
                                     kw:kw + Wo * stride:stride])
    cols = jnp.stack(taps, axis=2)                     # (N, C, k^3, Do, Ho, Wo)
    return cols.reshape(N, C * k ** 3, Do * Ho * Wo), (Do, Ho, Wo)


# ----------------------------------------------------------------------------
# UnetResBlock forward (input/output in NCDHW, like the PyTorch module)
# ----------------------------------------------------------------------------
def unet_res_block(x, params, kernel_size, stride):
    N, Cin, D, H, W = x.shape
    Cout = params["b1"].shape[0]
    k, s, p = kernel_size, stride, kernel_size // 2
    downsample = (Cin != Cout) or (s != 1)
    Cp = round_up(Cout, 8)

    # ---- conv1 (stride s) + fused GN1 stats ---------------------------------
    cols1, (Do, Ho, Wo) = im2col_3d(x, k, s, p)            # (N, Cin*k^3, L)
    L = Do * Ho * Wo
    TL = min(LANE_TILE_MAX, round_up(L, 128))
    Lp = round_up(L, TL)

    K1p = round_up(cols1.shape[1], 128)
    cols1 = pad_axis(pad_axis(cols1, 1, K1p), 2, Lp).astype(jnp.bfloat16)
    w1 = pad_axis(pad_axis(params["w1"].reshape(Cout, -1), 0, Cp), 1, K1p).astype(jnp.bfloat16)
    b1 = pad_axis(params["b1"].reshape(Cout, 1), 0, Cp).astype(jnp.float32)
    y1, m1, r1 = conv_matmul_stats(cols1, w1, b1, tl=TL, l_true=L)

    # ---- GroupNorm1 + LeakyReLU (bf16 activation feeds the next matmul) -----
    g1 = pad_axis(params["g1"].reshape(Cout, 1), 0, Cp)
    be1 = pad_axis(params["be1"].reshape(Cout, 1), 0, Cp)
    h1 = gn_lrelu(y1, m1, r1, g1, be1, tl=TL, out_dtype=jnp.bfloat16)

    # ---- conv2 (stride 1) + fused GN2 stats ----------------------------------
    h1_sp = h1[:, :Cout, :L].reshape(N, Cout, Do, Ho, Wo)
    cols2, _ = im2col_3d(h1_sp, k, 1, p)                   # (N, Cout*k^3, L) bf16
    K2p = round_up(cols2.shape[1], 128)
    cols2 = pad_axis(pad_axis(cols2, 1, K2p), 2, Lp).astype(jnp.bfloat16)
    w2 = pad_axis(pad_axis(params["w2"].reshape(Cout, -1), 0, Cp), 1, K2p).astype(jnp.bfloat16)
    b2 = pad_axis(params["b2"].reshape(Cout, 1), 0, Cp).astype(jnp.float32)
    y2, m2, r2 = conv_matmul_stats(cols2, w2, b2, tl=TL, l_true=L)
    g2 = pad_axis(params["g2"].reshape(Cout, 1), 0, Cp)
    be2 = pad_axis(params["be2"].reshape(Cout, 1), 0, Cp)

    # ---- residual branch ------------------------------------------------------
    if downsample:
        # 1x1x1 conv, stride s; the ::s subsample matches conv1's output grid
        # for odd kernel sizes with pad = k // 2 (true here).
        xr = x[:, :, ::s, ::s, ::s].reshape(N, Cin, L)
        Krp = round_up(Cin, 8)
        colsr = pad_axis(pad_axis(xr, 1, Krp), 2, Lp).astype(jnp.bfloat16)
        w3 = pad_axis(pad_axis(params["w3"], 0, Cp), 1, Krp).astype(jnp.bfloat16)
        b3 = pad_axis(params["b3"].reshape(Cout, 1), 0, Cp).astype(jnp.float32)
        res, m3, r3 = conv_matmul_stats(colsr, w3, b3, tl=TL, l_true=L)
        g3 = pad_axis(params["g3"].reshape(Cout, 1), 0, Cp)
        be3 = pad_axis(params["be3"].reshape(Cout, 1), 0, Cp)
    else:
        res = pad_axis(pad_axis(x.reshape(N, Cin, L), 1, Cp), 2, Lp)
        m3 = jnp.zeros((N, Cp, 1), jnp.float32)
        r3 = jnp.ones((N, Cp, 1), jnp.float32)
        g3 = jnp.ones((Cp, 1), jnp.float32)
        be3 = jnp.zeros((Cp, 1), jnp.float32)

    # ---- GN2 (+ GN3 on residual) + add + LeakyReLU, fused & tiled -------------
    out = final_fuse(y2, m2, r2, g2, be2, res, m3, r3, g3, be3, tl=TL)
    return out[:, :Cout, :L].reshape(N, Cout, Do, Ho, Wo)


# ----------------------------------------------------------------------------
# Pure-JAX reference (mirrors the PyTorch forward), NCDHW.
# conv_dtype=bf16 matches the kernels' MXU precision (f32 accumulation);
# conv_dtype=f32 is the full-precision semantic reference.
# ----------------------------------------------------------------------------
def unet_res_block_ref(x, params, kernel_size, stride, conv_dtype=jnp.float32):
    k, s, p = kernel_size, stride, kernel_size // 2
    Cin = x.shape[1]
    Cout = params["b1"].shape[0]
    downsample = (Cin != Cout) or (s != 1)
    dn = ("NCDHW", "OIDHW", "NCDHW")

    def conv(x_, w, b, strides, pad):
        y = lax.conv_general_dilated(
            x_.astype(conv_dtype), w.astype(conv_dtype),
            window_strides=(strides,) * 3, padding=[(pad, pad)] * 3,
            dimension_numbers=dn, preferred_element_type=jnp.float32,
            precision=lax.Precision.HIGHEST)
        return y + b.reshape(1, -1, 1, 1, 1)

    def gn(x_, g, b):
        mean = jnp.mean(x_, axis=(2, 3, 4), keepdims=True)
        var = jnp.mean((x_ - mean) ** 2, axis=(2, 3, 4), keepdims=True)
        return ((x_ - mean) * lax.rsqrt(var + EPS) * g.reshape(1, -1, 1, 1, 1)
                + b.reshape(1, -1, 1, 1, 1))

    def lrelu(t):
        return jnp.where(t >= 0, t, SLOPE * t)

    out = conv(x, params["w1"], params["b1"], s, p)
    out = lrelu(gn(out, params["g1"], params["be1"]))
    out = conv(out, params["w2"], params["b2"], 1, p)
    out = gn(out, params["g2"], params["be2"])
    res = x
    if downsample:
        w3 = params["w3"].reshape(Cout, Cin, 1, 1, 1)
        res = gn(conv(x, w3, params["b3"], s, 0), params["g3"], params["be3"])
    return lrelu(out + res)


# ----------------------------------------------------------------------------
if __name__ == "__main__":
    N, Cin, Cout, SP, K, STRIDE = 2, 4, 8, 8, 3, 2

    key = jax.random.PRNGKey(0)
    keys = jax.random.split(key, 13)
    f32 = jnp.float32
    params = dict(
        w1=0.1 * jax.random.normal(keys[0], (Cout, Cin, K, K, K), f32),   # OIDHW (PyTorch)
        b1=0.1 * jax.random.normal(keys[1], (Cout,), f32),
        g1=1.0 + 0.1 * jax.random.normal(keys[2], (Cout,), f32),
        be1=0.1 * jax.random.normal(keys[3], (Cout,), f32),
        w2=0.1 * jax.random.normal(keys[4], (Cout, Cout, K, K, K), f32),
        b2=0.1 * jax.random.normal(keys[5], (Cout,), f32),
        g2=1.0 + 0.1 * jax.random.normal(keys[6], (Cout,), f32),
        be2=0.1 * jax.random.normal(keys[7], (Cout,), f32),
        w3=0.1 * jax.random.normal(keys[8], (Cout, Cin), f32),            # 1x1x1 conv
        b3=0.1 * jax.random.normal(keys[9], (Cout,), f32),
        g3=1.0 + 0.1 * jax.random.normal(keys[10], (Cout,), f32),
        be3=0.1 * jax.random.normal(keys[11], (Cout,), f32),
    )
    x = jax.random.normal(keys[12], (N, Cin, SP, SP, SP), f32)            # NCDHW

    fwd = jax.jit(functools.partial(unet_res_block, kernel_size=K, stride=STRIDE))
    out = jax.block_until_ready(fwd(x, params))

    # Tight check vs. a matched-precision reference (bf16 MXU operands, f32 accum).
    ref_bf16 = unet_res_block_ref(x, params, K, STRIDE, conv_dtype=jnp.bfloat16)
    np.testing.assert_allclose(np.asarray(out), np.asarray(ref_bf16), rtol=5e-3, atol=5e-3)

    # Loose sanity check vs. the full-f32 semantic reference (bf16 matmul inputs
    # give ~1e-2 deviations, as anticipated by the performance review).
    ref_f32 = unet_res_block_ref(x, params, K, STRIDE, conv_dtype=jnp.float32)
    np.testing.assert_allclose(np.asarray(out), np.asarray(ref_f32), rtol=1e-1, atol=1e-1)

    print("KERNEL_OK")
</pallas_src>

<mosaic_0001>
module attributes {stable_mosaic.version = 11 : i64} {
  func.func @_gn_lrelu_kernel(%arg0: i32, %arg1: i32, %arg2: memref<1x8x128xf32, #tpu.memory_space<vmem>>, %arg3: memref<1x8x1xf32, #tpu.memory_space<vmem>>, %arg4: memref<1x8x1xf32, #tpu.memory_space<vmem>>, %arg5: memref<8x1xf32, #tpu.memory_space<vmem>>, %arg6: memref<8x1xf32, #tpu.memory_space<vmem>>, %arg7: memref<1x8x128xbf16, #tpu.memory_space<vmem>>) attributes {dimension_semantics = [#tpu.dimension_semantics<parallel>, #tpu.dimension_semantics<parallel>], iteration_bounds = array<i64: 2, 1>, scalar_prefetch = 0 : i64, scratch_operands = 0 : i64, tpu.core_type = #tpu.core_type<tc>, window_params = [{transform_indices = @transform_0, window_bounds = array<i64: 1, 8, 128>}, {transform_indices = @transform_1, window_bounds = array<i64: 1, 8, 1>}, {transform_indices = @transform_2, window_bounds = array<i64: 1, 8, 1>}, {pipeline_mode = #tpu.pipeline_mode<synchronous>, transform_indices = @transform_3, window_bounds = array<i64: 8, 1>}, {pipeline_mode = #tpu.pipeline_mode<synchronous>, transform_indices = @transform_4, window_bounds = array<i64: 8, 1>}, {transform_indices = @transform_5, window_bounds = array<i64: 1, 8, 128>}]} {
    %c0 = arith.constant 0 : index
    %c0_0 = arith.constant 0 : index
    %c0_1 = arith.constant 0 : index
    %0 = vector.load %arg2[%c0, %c0_0, %c0_1] : memref<1x8x128xf32, #tpu.memory_space<vmem>>, vector<1x8x128xf32>
    %1 = vector.shape_cast %0 : vector<1x8x128xf32> to vector<8x128xf32>
    %c0_2 = arith.constant 0 : index
    %c0_3 = arith.constant 0 : index
    %c0_4 = arith.constant 0 : index
    %2 = vector.load %arg3[%c0_2, %c0_3, %c0_4] : memref<1x8x1xf32, #tpu.memory_space<vmem>>, vector<1x8x1xf32>
    %3 = vector.shape_cast %2 : vector<1x8x1xf32> to vector<8x1xf32>
    %4 = vector.broadcast %3 : vector<8x1xf32> to vector<8x128xf32>
    %5 = arith.subf %1, %4 : vector<8x128xf32>
    %c0_5 = arith.constant 0 : index
    %c0_6 = arith.constant 0 : index
    %c0_7 = arith.constant 0 : index
    %6 = vector.load %arg4[%c0_5, %c0_6, %c0_7] : memref<1x8x1xf32, #tpu.memory_space<vmem>>, vector<1x8x1xf32>
    %7 = vector.shape_cast %6 : vector<1x8x1xf32> to vector<8x1xf32>
    %c0_8 = arith.constant 0 : index
    %c0_9 = arith.constant 0 : index
    %8 = vector.load %arg5[%c0_8, %c0_9] : memref<8x1xf32, #tpu.memory_space<vmem>>, vector<8x1xf32>
    %9 = arith.mulf %7, %8 : vector<8x1xf32>
    %10 = vector.broadcast %9 : vector<8x1xf32> to vector<8x128xf32>
    %11 = arith.mulf %5, %10 : vector<8x128xf32>
    %c0_10 = arith.constant 0 : index
    %c0_11 = arith.constant 0 : index
    %12 = vector.load %arg6[%c0_10, %c0_11] : memref<8x1xf32, #tpu.memory_space<vmem>>, vector<8x1xf32>
    %13 = vector.broadcast %12 : vector<8x1xf32> to vector<8x128xf32>
    %14 = arith.addf %11, %13 : vector<8x128xf32>
    %cst = arith.constant 0.000000e+00 : f32
    %15 = vector.broadcast %cst : f32 to vector<8x128xf32>
    %16 = arith.cmpf oge, %14, %15 : vector<8x128xf32>
    %cst_12 = arith.constant 0.00999999977 : f32
    %17 = vector.broadcast %cst_12 : f32 to vector<8x128xf32>
    %18 = arith.mulf %17, %14 : vector<8x128xf32>
    %19 = arith.select %16, %14, %18 : vector<8x128xi1>, vector<8x128xf32>
    %20 = arith.truncf %19 : vector<8x128xf32> to vector<8x128xbf16>
    %c0_13 = arith.constant 0 : index
    %c0_14 = arith.constant 0 : index
    %c0_15 = arith.constant 0 : index
    %21 = vector.load %arg7[%c0_13, %c0_14, %c0_15] : memref<1x8x128xbf16, #tpu.memory_space<vmem>>, vector<1x8x128xbf16>
    %22 = vector.shape_cast %21 : vector<1x8x128xbf16> to vector<8x128xbf16>
    %23 = vector.shape_cast %20 : vector<8x128xbf16> to vector<1x8x128xbf16>
    tpu.vector_store %arg7[%c0_13, %c0_14, %c0_15], %23 {strides = array<i32>} : memref<1x8x128xbf16, #tpu.memory_space<vmem>>, vector<1x8x128xbf16>,
    return
  }
  func.func @transform_0(%arg0: i32, %arg1: i32) -> (i32, i32, i32) {
    %c0_i32 = arith.constant 0 : i32
    %c0_i32_0 = arith.constant 0 : i32
    return %arg0, %c0_i32, %arg1 : i32, i32, i32
  }
  func.func @transform_1(%arg0: i32, %arg1: i32) -> (i32, i32, i32) {
    %c0_i32 = arith.constant 0 : i32
    %c0_i32_0 = arith.constant 0 : i32
    %c0_i32_1 = arith.constant 0 : i32
    return %arg0, %c0_i32, %c0_i32_0 : i32, i32, i32
  }
  func.func @transform_2(%arg0: i32, %arg1: i32) -> (i32, i32, i32) {
    %c0_i32 = arith.constant 0 : i32
    %c0_i32_0 = arith.constant 0 : i32
    %c0_i32_1 = arith.constant 0 : i32
    return %arg0, %c0_i32, %c0_i32_0 : i32, i32, i32
  }
  func.func @transform_3(%arg0: i32, %arg1: i32) -> (i32, i32) {
    %c0_i32 = arith.constant 0 : i32
    %c0_i32_0 = arith.constant 0 : i32
    %c0_i32_1 = arith.constant 0 : i32
    return %c0_i32, %c0_i32_0 : i32, i32
  }
  func.func @transform_4(%arg0: i32, %arg1: i32) -> (i32, i32) {
    %c0_i32 = arith.constant 0 : i32
    %c0_i32_0 = arith.constant 0 : i32
    %c0_i32_1 = arith.constant 0 : i32
    return %c0_i32, %c0_i32_0 : i32, i32
  }
  func.func @transform_5(%arg0: i32, %arg1: i32) -> (i32, i32, i32) {
    %c0_i32 = arith.constant 0 : i32
    %c0_i32_0 = arith.constant 0 : i32
    return %arg0, %c0_i32, %arg1 : i32, i32, i32
  }
}

module attributes {stable_mosaic.version = 11 : i64} {
  func.func @_conv_stats_kernel(%arg0: i32, %arg1: i32, %arg2: memref<1x128x128xbf16, #tpu.memory_space<vmem>>, %arg3: memref<8x128xbf16, #tpu.memory_space<vmem>>, %arg4: memref<8x1xf32, #tpu.memory_space<vmem>>, %arg5: memref<1x8x128xf32, #tpu.memory_space<vmem>>, %arg6: memref<1x8x1xf32, #tpu.memory_space<vmem>>, %arg7: memref<1x8x1xf32, #tpu.memory_space<vmem>>) attributes {dimension_semantics = [#tpu.dimension_semantics<parallel>, #tpu.dimension_semantics<arbitrary>], iteration_bounds = array<i64: 2, 1>, scalar_prefetch = 0 : i64, scratch_operands = 0 : i64, tpu.core_type = #tpu.core_type<tc>, window_params = [{transform_indices = @transform_0, window_bounds = array<i64: 1, 128, 128>}, {pipeline_mode = #tpu.pipeline_mode<synchronous>, transform_indices = @transform_1, window_bounds = array<i64: 8, 128>}, {pipeline_mode = #tpu.pipeline_mode<synchronous>, transform_indices = @transform_2, window_bounds = array<i64: 8, 1>}, {transform_indices = @transform_3, window_bounds = array<i64: 1, 8, 128>}, {transform_indices = @transform_4, window_bounds = array<i64: 1, 8, 1>}, {transform_indices = @transform_5, window_bounds = array<i64: 1, 8, 1>}]} {
    %c0 = arith.constant 0 : index
    %c0_0 = arith.constant 0 : index
    %0 = vector.load %arg4[%c0, %c0_0] : memref<8x1xf32, #tpu.memory_space<vmem>>, vector<8x1xf32>
    %c0_1 = arith.constant 0 : index
    %c0_2 = arith.constant 0 : index
    %1 = vector.load %arg3[%c0_1, %c0_2] : memref<8x128xbf16, #tpu.memory_space<vmem>>, vector<8x128xbf16>
    %c0_3 = arith.constant 0 : index
    %c0_4 = arith.constant 0 : index
    %c0_5 = arith.constant 0 : index
    %2 = vector.load %arg2[%c0_3, %c0_4, %c0_5] : memref<1x128x128xbf16, #tpu.memory_space<vmem>>, vector<1x128x128xbf16>
    %3 = vector.shape_cast %2 : vector<1x128x128xbf16> to vector<128x128xbf16>
    %cst = arith.constant dense<0.000000e+00> : vector<8x128xf32>
    %4 = tpu.matmul %1, %3, %cst {dimension_numbers = #tpu.dot_dimension_numbers<[1], [0], [0], [1], [0, 0, 1, 1], [], []>} : vector<8x128xbf16>, vector<128x128xbf16>, vector<8x128xf32> -> vector<8x128xf32>
    %5 = vector.broadcast %0 : vector<8x1xf32> to vector<8x128xf32>
    %6 = arith.addf %4, %5 : vector<8x128xf32>
    %c0_6 = arith.constant 0 : index
    %c0_7 = arith.constant 0 : index
    %c0_8 = arith.constant 0 : index
    %7 = vector.load %arg5[%c0_6, %c0_7, %c0_8] : memref<1x8x128xf32, #tpu.memory_space<vmem>>, vector<1x8x128xf32>
    %8 = vector.shape_cast %7 : vector<1x8x128xf32> to vector<8x128xf32>
    %9 = vector.shape_cast %6 : vector<8x128xf32> to vector<1x8x128xf32>
    tpu.vector_store %arg5[%c0_6, %c0_7, %c0_8], %9 {strides = array<i32>} : memref<1x8x128xf32, #tpu.memory_space<vmem>>, vector<1x8x128xf32>,
    %c0_i32 = arith.constant 0 : i32
    %10 = arith.cmpi eq, %arg1, %c0_i32 : i32
    %11 = arith.extui %10 : i1 to i32
    %c0_i32_9 = arith.constant 0 : i32
    %12 = arith.cmpi ne, %11, %c0_i32_9 : i32
    scf.if %12 {
      %cst_26 = arith.constant 0.000000e+00 : f32
      %33 = vector.broadcast %cst_26 : f32 to vector<8x1xf32>
      %c0_27 = arith.constant 0 : index
      %c0_28 = arith.constant 0 : index
      %c0_29 = arith.constant 0 : index
      %34 = vector.load %arg6[%c0_27, %c0_28, %c0_29] : memref<1x8x1xf32, #tpu.memory_space<vmem>>, vector<1x8x1xf32>
      %35 = vector.shape_cast %34 : vector<1x8x1xf32> to vector<8x1xf32>
      %36 = vector.shape_cast %33 : vector<8x1xf32> to vector<1x8x1xf32>
      tpu.vector_store %arg6[%c0_27, %c0_28, %c0_29], %36 {strides = array<i32>} : memref<1x8x1xf32, #tpu.memory_space<vmem>>, vector<1x8x1xf32>,
      %cst_30 = arith.constant 0.000000e+00 : f32
      %37 = vector.broadcast %cst_30 : f32 to vector<8x1xf32>
      %c0_31 = arith.constant 0 : index
      %c0_32 = arith.constant 0 : index
      %c0_33 = arith.constant 0 : index
      %38 = vector.load %arg7[%c0_31, %c0_32, %c0_33] : memref<1x8x1xf32, #tpu.memory_space<vmem>>, vector<1x8x1xf32>
      %39 = vector.shape_cast %38 : vector<1x8x1xf32> to vector<8x1xf32>
      %40 = vector.shape_cast %37 : vector<8x1xf32> to vector<1x8x1xf32>
      tpu.vector_store %arg7[%c0_31, %c0_32, %c0_33], %40 {strides = array<i32>} : memref<1x8x1xf32, #tpu.memory_space<vmem>>, vector<1x8x1xf32>,
    } else {
    }
    %c0_10 = arith.constant 0 : index
    %c0_11 = arith.constant 0 : index
    %c0_12 = arith.constant 0 : index
    %13 = vector.load %arg6[%c0_10, %c0_11, %c0_12] : memref<1x8x1xf32, #tpu.memory_space<vmem>>, vector<1x8x1xf32>
    %14 = vector.shape_cast %13 : vector<1x8x1xf32> to vector<8x1xf32>
    %cst_13 = arith.constant dense<0.000000e+00> : vector<8xf32>
    %15 = vector.multi_reduction <add>, %6, %cst_13 [1] : vector<8x128xf32> to vector<8xf32>
    %16 = vector.shape_cast %15 : vector<8xf32> to vector<8x1xf32>
    %17 = arith.addf %14, %16 : vector<8x1xf32>
    %c0_14 = arith.constant 0 : index
    %c0_15 = arith.constant 0 : index
    %c0_16 = arith.constant 0 : index
    %18 = vector.load %arg6[%c0_14, %c0_15, %c0_16] : memref<1x8x1xf32, #tpu.memory_space<vmem>>, vector<1x8x1xf32>
    %19 = vector.shape_cast %18 : vector<1x8x1xf32> to vector<8x1xf32>
    %20 = vector.shape_cast %17 : vector<8x1xf32> to vector<1x8x1xf32>
    tpu.vector_store %arg6[%c0_14, %c0_15, %c0_16], %20 {strides = array<i32>} : memref<1x8x1xf32, #tpu.memory_space<vmem>>, vector<1x8x1xf32>,
    %c0_17 = arith.constant 0 : index
    %c0_18 = arith.constant 0 : index
    %c0_19 = arith.constant 0 : index
    %21 = vector.load %arg7[%c0_17, %c0_18, %c0_19] : memref<1x8x1xf32, #tpu.memory_space<vmem>>, vector<1x8x1xf32>
    %22 = vector.shape_cast %21 : vector<1x8x1xf32> to vector<8x1xf32>
    %23 = arith.mulf %6, %6 : vector<8x128xf32>
    %cst_20 = arith.constant dense<0.000000e+00> : vector<8xf32>
    %24 = vector.multi_reduction <add>, %23, %cst_20 [1] : vector<8x128xf32> to vector<8xf32>
    %25 = vector.shape_cast %24 : vector<8xf32> to vector<8x1xf32>
    %26 = arith.addf %22, %25 : vector<8x1xf32>
    %c0_21 = arith.constant 0 : index
    %c0_22 = arith.constant 0 : index
    %c0_23 = arith.constant 0 : index
    %27 = vector.load %arg7[%c0_21, %c0_22, %c0_23] : memref<1x8x1xf32, #tpu.memory_space<vmem>>, vector<1x8x1xf32>
    %28 = vector.shape_cast %27 : vector<1x8x1xf32> to vector<8x1xf32>
    %29 = vector.shape_cast %26 : vector<8x1xf32> to vector<1x8x1xf32>
    tpu.vector_store %arg7[%c0_21, %c0_22, %c0_23], %29 {strides = array<i32>} : memref<1x8x1xf32, #tpu.memory_space<vmem>>, vector<1x8x1xf32>,
    %c0_i32_24 = arith.constant 0 : i32
    %30 = arith.cmpi eq, %arg1, %c0_i32_24 : i32
    %31 = arith.extui %30 : i1 to i32
    %c0_i32_25 = arith.constant 0 : i32
    %32 = arith.cmpi ne, %31, %c0_i32_25 : i32
    scf.if %32 {
      %c0_26 = arith.constant 0 : index
      %c0_27 = arith.constant 0 : index
      %c0_28 = arith.constant 0 : index
      %33 = vector.load %arg6[%c0_26, %c0_27, %c0_28] : memref<1x8x1xf32, #tpu.memory_space<vmem>>, vector<1x8x1xf32>
      %34 = vector.shape_cast %33 : vector<1x8x1xf32> to vector<8x1xf32>
      %cst_29 = arith.constant 6.400000e+01 : f32
      %35 = vector.broadcast %cst_29 : f32 to vector<8x1xf32>
      %36 = arith.mulf %35, %0 : vector<8x1xf32>
      %37 = arith.subf %34, %36 : vector<8x1xf32>
      %c0_30 = arith.constant 0 : index
      %c0_31 = arith.constant 0 : index
      %c0_32 = arith.constant 0 : index
      %38 = vector.load %arg7[%c0_30, %c0_31, %c0_32] : memref<1x8x1xf32, #tpu.memory_space<vmem>>, vector<1x8x1xf32>
      %39 = vector.shape_cast %38 : vector<1x8x1xf32> to vector<8x1xf32>
      %40 = arith.mulf %0, %0 : vector<8x1xf32>
      %cst_33 = arith.constant 6.400000e+01 : f32
      %41 = vector.broadcast %cst_33 : f32 to vector<8x1xf32>
      %42 = arith.mulf %41, %40 : vector<8x1xf32>
      %43 = arith.subf %39, %42 : vector<8x1xf32>
      %cst_34 = arith.constant 1.562500e-02 : f32
      %44 = vector.broadcast %cst_34 : f32 to vector<8x1xf32>
      %45 = arith.mulf %37, %44 : vector<8x1xf32>
      %cst_35 = arith.constant 1.562500e-02 : f32
      %46 = vector.broadcast %cst_35 : f32 to vector<8x1xf32>
      %47 = arith.mulf %43, %46 : vector<8x1xf32>
      %48 = arith.mulf %45, %45 : vector<8x1xf32>
      %49 = arith.subf %47, %48 : vector<8x1xf32>
      %c0_36 = arith.constant 0 : index
      %c0_37 = arith.constant 0 : index
      %c0_38 = arith.constant 0 : index
      %50 = vector.load %arg6[%c0_36, %c0_37, %c0_38] : memref<1x8x1xf32, #tpu.memory_space<vmem>>, vector<1x8x1xf32>
      %51 = vector.shape_cast %50 : vector<1x8x1xf32> to vector<8x1xf32>
      %52 = vector.shape_cast %45 : vector<8x1xf32> to vector<1x8x1xf32>
      tpu.vector_store %arg6[%c0_36, %c0_37, %c0_38], %52 {strides = array<i32>} : memref<1x8x1xf32, #tpu.memory_space<vmem>>, vector<1x8x1xf32>,
      %cst_39 = arith.constant 9.99999974E-6 : f32
      %53 = vector.broadcast %cst_39 : f32 to vector<8x1xf32>
      %54 = arith.addf %49, %53 : vector<8x1xf32>
      %55 = math.rsqrt %54 : vector<8x1xf32>
      %c0_40 = arith.constant 0 : index
      %c0_41 = arith.constant 0 : index
      %c0_42 = arith.constant 0 : index
      %56 = vector.load %arg7[%c0_40, %c0_41, %c0_42] : memref<1x8x1xf32, #tpu.memory_space<vmem>>, vector<1x8x1xf32>
      %57 = vector.shape_cast %56 : vector<1x8x1xf32> to vector<8x1xf32>
      %58 = vector.shape_cast %55 : vector<8x1xf32> to vector<1x8x1xf32>
      tpu.vector_store %arg7[%c0_40, %c0_41, %c0_42], %58 {strides = array<i32>} : memref<1x8x1xf32, #tpu.memory_space<vmem>>, vector<1x8x1xf32>,
    } else {
    }
    return
  }
  func.func @transform_0(%arg0: i32, %arg1: i32) -> (i32, i32, i32) {
    %c0_i32 = arith.constant 0 : i32
    %c0_i32_0 = arith.constant 0 : i32
    return %arg0, %c0_i32, %arg1 : i32, i32, i32
  }
  func.func @transform_1(%arg0: i32, %arg1: i32) -> (i32, i32) {
    %c0_i32 = arith.constant 0 : i32
    %c0_i32_0 = arith.constant 0 : i32
    %c0_i32_1 = arith.constant 0 : i32
    return %c0_i32, %c0_i32_0 : i32, i32
  }
  func.func @transform_2(%arg0: i32, %arg1: i32) -> (i32, i32) {
    %c0_i32 = arith.constant 0 : i32
    %c0_i32_0 = arith.constant 0 : i32
    %c0_i32_1 = arith.constant 0 : i32
    return %c0_i32, %c0_i32_0 : i32, i32
  }
  func.func @transform_3(%arg0: i32, %arg1: i32) -> (i32, i32, i32) {
    %c0_i32 = arith.constant 0 : i32
    %c0_i32_0 = arith.constant 0 : i32
    return %arg0, %c0_i32, %arg1 : i32, i32, i32
  }
  func.func @transform_4(%arg0: i32, %arg1: i32) -> (i32, i32, i32) {
    %c0_i32 = arith.constant 0 : i32
    %c0_i32_0 = arith.constant 0 : i32
    %c0_i32_1 = arith.constant 0 : i32
    return %arg0, %c0_i32, %c0_i32_0 : i32, i32, i32
  }
  func.func @transform_5(%arg0: i32, %arg1: i32) -> (i32, i32, i32) {
    %c0_i32 = arith.constant 0 : i32
    %c0_i32_0 = arith.constant 0 : i32
    %c0_i32_1 = arith.constant 0 : i32
    return %arg0, %c0_i32, %c0_i32_0 : i32, i32, i32
  }
}

module attributes {stable_mosaic.version = 11 : i64} {
  func.func @_conv_stats_kernel(%arg0: i32, %arg1: i32, %arg2: memref<1x256x128xbf16, #tpu.memory_space<vmem>>, %arg3: memref<8x256xbf16, #tpu.memory_space<vmem>>, %arg4: memref<8x1xf32, #tpu.memory_space<vmem>>, %arg5: memref<1x8x128xf32, #tpu.memory_space<vmem>>, %arg6: memref<1x8x1xf32, #tpu.memory_space<vmem>>, %arg7: memref<1x8x1xf32, #tpu.memory_space<vmem>>) attributes {dimension_semantics = [#tpu.dimension_semantics<parallel>, #tpu.dimension_semantics<arbitrary>], iteration_bounds = array<i64: 2, 1>, scalar_prefetch = 0 : i64, scratch_operands = 0 : i64, tpu.core_type = #tpu.core_type<tc>, window_params = [{transform_indices = @transform_0, window_bounds = array<i64: 1, 256, 128>}, {pipeline_mode = #tpu.pipeline_mode<synchronous>, transform_indices = @transform_1, window_bounds = array<i64: 8, 256>}, {pipeline_mode = #tpu.pipeline_mode<synchronous>, transform_indices = @transform_2, window_bounds = array<i64: 8, 1>}, {transform_indices = @transform_3, window_bounds = array<i64: 1, 8, 128>}, {transform_indices = @transform_4, window_bounds = array<i64: 1, 8, 1>}, {transform_indices = @transform_5, window_bounds = array<i64: 1, 8, 1>}]} {
    %c0 = arith.constant 0 : index
    %c0_0 = arith.constant 0 : index
    %0 = vector.load %arg4[%c0, %c0_0] : memref<8x1xf32, #tpu.memory_space<vmem>>, vector<8x1xf32>
    %c0_1 = arith.constant 0 : index
    %c0_2 = arith.constant 0 : index
    %1 = vector.load %arg3[%c0_1, %c0_2] : memref<8x256xbf16, #tpu.memory_space<vmem>>, vector<8x256xbf16>
    %c0_3 = arith.constant 0 : index
    %c0_4 = arith.constant 0 : index
    %c0_5 = arith.constant 0 : index
    %2 = vector.load %arg2[%c0_3, %c0_4, %c0_5] : memref<1x256x128xbf16, #tpu.memory_space<vmem>>, vector<1x256x128xbf16>
    %3 = vector.shape_cast %2 : vector<1x256x128xbf16> to vector<256x128xbf16>
    %cst = arith.constant dense<0.000000e+00> : vector<8x128xf32>
    %4 = tpu.matmul %1, %3, %cst {dimension_numbers = #tpu.dot_dimension_numbers<[1], [0], [0], [1], [0, 0, 1, 1], [], []>} : vector<8x256xbf16>, vector<256x128xbf16>, vector<8x128xf32> -> vector<8x128xf32>
    %5 = vector.broadcast %0 : vector<8x1xf32> to vector<8x128xf32>
    %6 = arith.addf %4, %5 : vector<8x128xf32>
    %c0_6 = arith.constant 0 : index
    %c0_7 = arith.constant 0 : index
    %c0_8 = arith.constant 0 : index
    %7 = vector.load %arg5[%c0_6, %c0_7, %c0_8] : memref<1x8x128xf32, #tpu.memory_space<vmem>>, vector<1x8x128xf32>
    %8 = vector.shape_cast %7 : vector<1x8x128xf32> to vector<8x128xf32>
    %9 = vector.shape_cast %6 : vector<8x128xf32> to vector<1x8x128xf32>
    tpu.vector_store %arg5[%c0_6, %c0_7, %c0_8], %9 {strides = array<i32>} : memref<1x8x128xf32, #tpu.memory_space<vmem>>, vector<1x8x128xf32>,
    %c0_i32 = arith.constant 0 : i32
    %10 = arith.cmpi eq, %arg1, %c0_i32 : i32
    %11 = arith.extui %10 : i1 to i32
    %c0_i32_9 = arith.constant 0 : i32
    %12 = arith.cmpi ne, %11, %c0_i32_9 : i32
    scf.if %12 {
      %cst_26 = arith.constant 0.000000e+00 : f32
      %33 = vector.broadcast %cst_26 : f32 to vector<8x1xf32>
      %c0_27 = arith.constant 0 : index
      %c0_28 = arith.constant 0 : index
      %c0_29 = arith.constant 0 : index
      %34 = vector.load %arg6[%c0_27, %c0_28, %c0_29] : memref<1x8x1xf32, #tpu.memory_space<vmem>>, vector<1x8x1xf32>
      %35 = vector.shape_cast %34 : vector<1x8x1xf32> to vector<8x1xf32>
      %36 = vector.shape_cast %33 : vector<8x1xf32> to vector<1x8x1xf32>
      tpu.vector_store %arg6[%c0_27, %c0_28, %c0_29], %36 {strides = array<i32>} : memref<1x8x1xf32, #tpu.memory_space<vmem>>, vector<1x8x1xf32>,
      %cst_30 = arith.constant 0.000000e+00 : f32
      %37 = vector.broadcast %cst_30 : f32 to vector<8x1xf32>
      %c0_31 = arith.constant 0 : index
      %c0_32 = arith.constant 0 : index
      %c0_33 = arith.constant 0 : index
      %38 = vector.load %arg7[%c0_31, %c0_32, %c0_33] : memref<1x8x1xf32, #tpu.memory_space<vmem>>, vector<1x8x1xf32>
      %39 = vector.shape_cast %38 : vector<1x8x1xf32> to vector<8x1xf32>
      %40 = vector.shape_cast %37 : vector<8x1xf32> to vector<1x8x1xf32>
      tpu.vector_store %arg7[%c0_31, %c0_32, %c0_33], %40 {strides = array<i32>} : memref<1x8x1xf32, #tpu.memory_space<vmem>>, vector<1x8x1xf32>,
    } else {
    }
    %c0_10 = arith.constant 0 : index
    %c0_11 = arith.constant 0 : index
    %c0_12 = arith.constant 0 : index
    %13 = vector.load %arg6[%c0_10, %c0_11, %c0_12] : memref<1x8x1xf32, #tpu.memory_space<vmem>>, vector<1x8x1xf32>
    %14 = vector.shape_cast %13 : vector<1x8x1xf32> to vector<8x1xf32>
    %cst_13 = arith.constant dense<0.000000e+00> : vector<8xf32>
    %15 = vector.multi_reduction <add>, %6, %cst_13 [1] : vector<8x128xf32> to vector<8xf32>
    %16 = vector.shape_cast %15 : vector<8xf32> to vector<8x1xf32>
    %17 = arith.addf %14, %16 : vector<8x1xf32>
    %c0_14 = arith.constant 0 : index
    %c0_15 = arith.constant 0 : index
    %c0_16 = arith.constant 0 : index
    %18 = vector.load %arg6[%c0_14, %c0_15, %c0_16] : memref<1x8x1xf32, #tpu.memory_space<vmem>>, vector<1x8x1xf32>
    %19 = vector.shape_cast %18 : vector<1x8x1xf32> to vector<8x1xf32>
    %20 = vector.shape_cast %17 : vector<8x1xf32> to vector<1x8x1xf32>
    tpu.vector_store %arg6[%c0_14, %c0_15, %c0_16], %20 {strides = array<i32>} : memref<1x8x1xf32, #tpu.memory_space<vmem>>, vector<1x8x1xf32>,
    %c0_17 = arith.constant 0 : index
    %c0_18 = arith.constant 0 : index
    %c0_19 = arith.constant 0 : index
    %21 = vector.load %arg7[%c0_17, %c0_18, %c0_19] : memref<1x8x1xf32, #tpu.memory_space<vmem>>, vector<1x8x1xf32>
    %22 = vector.shape_cast %21 : vector<1x8x1xf32> to vector<8x1xf32>
    %23 = arith.mulf %6, %6 : vector<8x128xf32>
    %cst_20 = arith.constant dense<0.000000e+00> : vector<8xf32>
    %24 = vector.multi_reduction <add>, %23, %cst_20 [1] : vector<8x128xf32> to vector<8xf32>
    %25 = vector.shape_cast %24 : vector<8xf32> to vector<8x1xf32>
    %26 = arith.addf %22, %25 : vector<8x1xf32>
    %c0_21 = arith.constant 0 : index
    %c0_22 = arith.constant 0 : index
    %c0_23 = arith.constant 0 : index
    %27 = vector.load %arg7[%c0_21, %c0_22, %c0_23] : memref<1x8x1xf32, #tpu.memory_space<vmem>>, vector<1x8x1xf32>
    %28 = vector.shape_cast %27 : vector<1x8x1xf32> to vector<8x1xf32>
    %29 = vector.shape_cast %26 : vector<8x1xf32> to vector<1x8x1xf32>
    tpu.vector_store %arg7[%c0_21, %c0_22, %c0_23], %29 {strides = array<i32>} : memref<1x8x1xf32, #tpu.memory_space<vmem>>, vector<1x8x1xf32>,
    %c0_i32_24 = arith.constant 0 : i32
    %30 = arith.cmpi eq, %arg1, %c0_i32_24 : i32
    %31 = arith.extui %30 : i1 to i32
    %c0_i32_25 = arith.constant 0 : i32
    %32 = arith.cmpi ne, %31, %c0_i32_25 : i32
    scf.if %32 {
      %c0_26 = arith.constant 0 : index
      %c0_27 = arith.constant 0 : index
      %c0_28 = arith.constant 0 : index
      %33 = vector.load %arg6[%c0_26, %c0_27, %c0_28] : memref<1x8x1xf32, #tpu.memory_space<vmem>>, vector<1x8x1xf32>
      %34 = vector.shape_cast %33 : vector<1x8x1xf32> to vector<8x1xf32>
      %cst_29 = arith.constant 6.400000e+01 : f32
      %35 = vector.broadcast %cst_29 : f32 to vector<8x1xf32>
      %36 = arith.mulf %35, %0 : vector<8x1xf32>
      %37 = arith.subf %34, %36 : vector<8x1xf32>
      %c0_30 = arith.constant 0 : index
      %c0_31 = arith.constant 0 : index
      %c0_32 = arith.constant 0 : index
      %38 = vector.load %arg7[%c0_30, %c0_31, %c0_32] : memref<1x8x1xf32, #tpu.memory_space<vmem>>, vector<1x8x1xf32>
      %39 = vector.shape_cast %38 : vector<1x8x1xf32> to vector<8x1xf32>
      %40 = arith.mulf %0, %0 : vector<8x1xf32>
      %cst_33 = arith.constant 6.400000e+01 : f32
      %41 = vector.broadcast %cst_33 : f32 to vector<8x1xf32>
      %42 = arith.mulf %41, %40 : vector<8x1xf32>
      %43 = arith.subf %39, %42 : vector<8x1xf32>
      %cst_34 = arith.constant 1.562500e-02 : f32
      %44 = vector.broadcast %cst_34 : f32 to vector<8x1xf32>
      %45 = arith.mulf %37, %44 : vector<8x1xf32>
      %cst_35 = arith.constant 1.562500e-02 : f32
      %46 = vector.broadcast %cst_35 : f32 to vector<8x1xf32>
      %47 = arith.mulf %43, %46 : vector<8x1xf32>
      %48 = arith.mulf %45, %45 : vector<8x1xf32>
      %49 = arith.subf %47, %48 : vector<8x1xf32>
      %c0_36 = arith.constant 0 : index
      %c0_37 = arith.constant 0 : index
      %c0_38 = arith.constant 0 : index
      %50 = vector.load %arg6[%c0_36, %c0_37, %c0_38] : memref<1x8x1xf32, #tpu.memory_space<vmem>>, vector<1x8x1xf32>
      %51 = vector.shape_cast %50 : vector<1x8x1xf32> to vector<8x1xf32>
      %52 = vector.shape_cast %45 : vector<8x1xf32> to vector<1x8x1xf32>
      tpu.vector_store %arg6[%c0_36, %c0_37, %c0_38], %52 {strides = array<i32>} : memref<1x8x1xf32, #tpu.memory_space<vmem>>, vector<1x8x1xf32>,
      %cst_39 = arith.constant 9.99999974E-6 : f32
      %53 = vector.broadcast %cst_39 : f32 to vector<8x1xf32>
      %54 = arith.addf %49, %53 : vector<8x1xf32>
      %55 = math.rsqrt %54 : vector<8x1xf32>
      %c0_40 = arith.constant 0 : index
      %c0_41 = arith.constant 0 : index
      %c0_42 = arith.constant 0 : index
      %56 = vector.load %arg7[%c0_40, %c0_41, %c0_42] : memref<1x8x1xf32, #tpu.memory_space<vmem>>, vector<1x8x1xf32>
      %57 = vector.shape_cast %56 : vector<1x8x1xf32> to vector<8x1xf32>
      %58 = vector.shape_cast %55 : vector<8x1xf32> to vector<1x8x1xf32>
      tpu.vector_store %arg7[%c0_40, %c0_41, %c0_42], %58 {strides = array<i32>} : memref<1x8x1xf32, #tpu.memory_space<vmem>>, vector<1x8x1xf32>,
    } else {
    }
    return
  }
  func.func @transform_0(%arg0: i32, %arg1: i32) -> (i32, i32, i32) {
    %c0_i32 = arith.constant 0 : i32
    %c0_i32_0 = arith.constant 0 : i32
    return %arg0, %c0_i32, %arg1 : i32, i32, i32
  }
  func.func @transform_1(%arg0: i32, %arg1: i32) -> (i32, i32) {
    %c0_i32 = arith.constant 0 : i32
    %c0_i32_0 = arith.constant 0 : i32
    %c0_i32_1 = arith.constant 0 : i32
    return %c0_i32, %c0_i32_0 : i32, i32
  }
  func.func @transform_2(%arg0: i32, %arg1: i32) -> (i32, i32) {
    %c0_i32 = arith.constant 0 : i32
    %c0_i32_0 = arith.constant 0 : i32
    %c0_i32_1 = arith.constant 0 : i32
    return %c0_i32, %c0_i32_0 : i32, i32
  }
  func.func @transform_3(%arg0: i32, %arg1: i32) -> (i32, i32, i32) {
    %c0_i32 = arith.constant 0 : i32
    %c0_i32_0 = arith.constant 0 : i32
    return %arg0, %c0_i32, %arg1 : i32, i32, i32
  }
  func.func @transform_4(%arg0: i32, %arg1: i32) -> (i32, i32, i32) {
    %c0_i32 = arith.constant 0 : i32
    %c0_i32_0 = arith.constant 0 : i32
    %c0_i32_1 = arith.constant 0 : i32
    return %arg0, %c0_i32, %c0_i32_0 : i32, i32, i32
  }
  func.func @transform_5(%arg0: i32, %arg1: i32) -> (i32, i32, i32) {
    %c0_i32 = arith.constant 0 : i32
    %c0_i32_0 = arith.constant 0 : i32
    %c0_i32_1 = arith.constant 0 : i32
    return %arg0, %c0_i32, %c0_i32_0 : i32, i32, i32
  }
}

module attributes {stable_mosaic.version = 11 : i64} {
  func.func @_conv_stats_kernel(%arg0: i32, %arg1: i32, %arg2: memref<1x8x128xbf16, #tpu.memory_space<vmem>>, %arg3: memref<8x8xbf16, #tpu.memory_space<vmem>>, %arg4: memref<8x1xf32, #tpu.memory_space<vmem>>, %arg5: memref<1x8x128xf32, #tpu.memory_space<vmem>>, %arg6: memref<1x8x1xf32, #tpu.memory_space<vmem>>, %arg7: memref<1x8x1xf32, #tpu.memory_space<vmem>>) attributes {dimension_semantics = [#tpu.dimension_semantics<parallel>, #tpu.dimension_semantics<arbitrary>], iteration_bounds = array<i64: 2, 1>, scalar_prefetch = 0 : i64, scratch_operands = 0 : i64, tpu.core_type = #tpu.core_type<tc>, window_params = [{transform_indices = @transform_0, window_bounds = array<i64: 1, 8, 128>}, {pipeline_mode = #tpu.pipeline_mode<synchronous>, transform_indices = @transform_1, window_bounds = array<i64: 8, 8>}, {pipeline_mode = #tpu.pipeline_mode<synchronous>, transform_indices = @transform_2, window_bounds = array<i64: 8, 1>}, {transform_indices = @transform_3, window_bounds = array<i64: 1, 8, 128>}, {transform_indices = @transform_4, window_bounds = array<i64: 1, 8, 1>}, {transform_indices = @transform_5, window_bounds = array<i64: 1, 8, 1>}]} {
    %c0 = arith.constant 0 : index
    %c0_0 = arith.constant 0 : index
    %0 = vector.load %arg4[%c0, %c0_0] : memref<8x1xf32, #tpu.memory_space<vmem>>, vector<8x1xf32>
    %c0_1 = arith.constant 0 : index
    %c0_2 = arith.constant 0 : index
    %1 = vector.load %arg3[%c0_1, %c0_2] : memref<8x8xbf16, #tpu.memory_space<vmem>>, vector<8x8xbf16>
    %c0_3 = arith.constant 0 : index
    %c0_4 = arith.constant 0 : index
    %c0_5 = arith.constant 0 : index
    %2 = vector.load %arg2[%c0_3, %c0_4, %c0_5] : memref<1x8x128xbf16, #tpu.memory_space<vmem>>, vector<1x8x128xbf16>
    %3 = vector.shape_cast %2 : vector<1x8x128xbf16> to vector<8x128xbf16>
    %cst = arith.constant dense<0.000000e+00> : vector<8x128xf32>
    %4 = tpu.matmul %1, %3, %cst {dimension_numbers = #tpu.dot_dimension_numbers<[1], [0], [0], [1], [0, 0, 1, 1], [], []>} : vector<8x8xbf16>, vector<8x128xbf16>, vector<8x128xf32> -> vector<8x128xf32>
    %5 = vector.broadcast %0 : vector<8x1xf32> to vector<8x128xf32>
    %6 = arith.addf %4, %5 : vector<8x128xf32>
    %c0_6 = arith.constant 0 : index
    %c0_7 = arith.constant 0 : index
    %c0_8 = arith.constant 0 : index
    %7 = vector.load %arg5[%c0_6, %c0_7, %c0_8] : memref<1x8x128xf32, #tpu.memory_space<vmem>>, vector<1x8x128xf32>
    %8 = vector.shape_cast %7 : vector<1x8x128xf32> to vector<8x128xf32>
    %9 = vector.shape_cast %6 : vector<8x128xf32> to vector<1x8x128xf32>
    tpu.vector_store %arg5[%c0_6, %c0_7, %c0_8], %9 {strides = array<i32>} : memref<1x8x128xf32, #tpu.memory_space<vmem>>, vector<1x8x128xf32>,
    %c0_i32 = arith.constant 0 : i32
    %10 = arith.cmpi eq, %arg1, %c0_i32 : i32
    %11 = arith.extui %10 : i1 to i32
    %c0_i32_9 = arith.constant 0 : i32
    %12 = arith.cmpi ne, %11, %c0_i32_9 : i32
    scf.if %12 {
      %cst_26 = arith.constant 0.000000e+00 : f32
      %33 = vector.broadcast %cst_26 : f32 to vector<8x1xf32>
      %c0_27 = arith.constant 0 : index
      %c0_28 = arith.constant 0 : index
      %c0_29 = arith.constant 0 : index
      %34 = vector.load %arg6[%c0_27, %c0_28, %c0_29] : memref<1x8x1xf32, #tpu.memory_space<vmem>>, vector<1x8x1xf32>
      %35 = vector.shape_cast %34 : vector<1x8x1xf32> to vector<8x1xf32>
      %36 = vector.shape_cast %33 : vector<8x1xf32> to vector<1x8x1xf32>
      tpu.vector_store %arg6[%c0_27, %c0_28, %c0_29], %36 {strides = array<i32>} : memref<1x8x1xf32, #tpu.memory_space<vmem>>, vector<1x8x1xf32>,
      %cst_30 = arith.constant 0.000000e+00 : f32
      %37 = vector.broadcast %cst_30 : f32 to vector<8x1xf32>
      %c0_31 = arith.constant 0 : index
      %c0_32 = arith.constant 0 : index
      %c0_33 = arith.constant 0 : index
      %38 = vector.load %arg7[%c0_31, %c0_32, %c0_33] : memref<1x8x1xf32, #tpu.memory_space<vmem>>, vector<1x8x1xf32>
      %39 = vector.shape_cast %38 : vector<1x8x1xf32> to vector<8x1xf32>
      %40 = vector.shape_cast %37 : vector<8x1xf32> to vector<1x8x1xf32>
      tpu.vector_store %arg7[%c0_31, %c0_32, %c0_33], %40 {strides = array<i32>} : memref<1x8x1xf32, #tpu.memory_space<vmem>>, vector<1x8x1xf32>,
    } else {
    }
    %c0_10 = arith.constant 0 : index
    %c0_11 = arith.constant 0 : index
    %c0_12 = arith.constant 0 : index
    %13 = vector.load %arg6[%c0_10, %c0_11, %c0_12] : memref<1x8x1xf32, #tpu.memory_space<vmem>>, vector<1x8x1xf32>
    %14 = vector.shape_cast %13 : vector<1x8x1xf32> to vector<8x1xf32>
    %cst_13 = arith.constant dense<0.000000e+00> : vector<8xf32>
    %15 = vector.multi_reduction <add>, %6, %cst_13 [1] : vector<8x128xf32> to vector<8xf32>
    %16 = vector.shape_cast %15 : vector<8xf32> to vector<8x1xf32>
    %17 = arith.addf %14, %16 : vector<8x1xf32>
    %c0_14 = arith.constant 0 : index
    %c0_15 = arith.constant 0 : index
    %c0_16 = arith.constant 0 : index
    %18 = vector.load %arg6[%c0_14, %c0_15, %c0_16] : memref<1x8x1xf32, #tpu.memory_space<vmem>>, vector<1x8x1xf32>
    %19 = vector.shape_cast %18 : vector<1x8x1xf32> to vector<8x1xf32>
    %20 = vector.shape_cast %17 : vector<8x1xf32> to vector<1x8x1xf32>
    tpu.vector_store %arg6[%c0_14, %c0_15, %c0_16], %20 {strides = array<i32>} : memref<1x8x1xf32, #tpu.memory_space<vmem>>, vector<1x8x1xf32>,
    %c0_17 = arith.constant 0 : index
    %c0_18 = arith.constant 0 : index
    %c0_19 = arith.constant 0 : index
    %21 = vector.load %arg7[%c0_17, %c0_18, %c0_19] : memref<1x8x1xf32, #tpu.memory_space<vmem>>, vector<1x8x1xf32>
    %22 = vector.shape_cast %21 : vector<1x8x1xf32> to vector<8x1xf32>
    %23 = arith.mulf %6, %6 : vector<8x128xf32>
    %cst_20 = arith.constant dense<0.000000e+00> : vector<8xf32>
    %24 = vector.multi_reduction <add>, %23, %cst_20 [1] : vector<8x128xf32> to vector<8xf32>
    %25 = vector.shape_cast %24 : vector<8xf32> to vector<8x1xf32>
    %26 = arith.addf %22, %25 : vector<8x1xf32>
    %c0_21 = arith.constant 0 : index
    %c0_22 = arith.constant 0 : index
    %c0_23 = arith.constant 0 : index
    %27 = vector.load %arg7[%c0_21, %c0_22, %c0_23] : memref<1x8x1xf32, #tpu.memory_space<vmem>>, vector<1x8x1xf32>
    %28 = vector.shape_cast %27 : vector<1x8x1xf32> to vector<8x1xf32>
    %29 = vector.shape_cast %26 : vector<8x1xf32> to vector<1x8x1xf32>
    tpu.vector_store %arg7[%c0_21, %c0_22, %c0_23], %29 {strides = array<i32>} : memref<1x8x1xf32, #tpu.memory_space<vmem>>, vector<1x8x1xf32>,
    %c0_i32_24 = arith.constant 0 : i32
    %30 = arith.cmpi eq, %arg1, %c0_i32_24 : i32
    %31 = arith.extui %30 : i1 to i32
    %c0_i32_25 = arith.constant 0 : i32
    %32 = arith.cmpi ne, %31, %c0_i32_25 : i32
    scf.if %32 {
      %c0_26 = arith.constant 0 : index
      %c0_27 = arith.constant 0 : index
      %c0_28 = arith.constant 0 : index
      %33 = vector.load %arg6[%c0_26, %c0_27, %c0_28] : memref<1x8x1xf32, #tpu.memory_space<vmem>>, vector<1x8x1xf32>
      %34 = vector.shape_cast %33 : vector<1x8x1xf32> to vector<8x1xf32>
      %cst_29 = arith.constant 6.400000e+01 : f32
      %35 = vector.broadcast %cst_29 : f32 to vector<8x1xf32>
      %36 = arith.mulf %35, %0 : vector<8x1xf32>
      %37 = arith.subf %34, %36 : vector<8x1xf32>
      %c0_30 = arith.constant 0 : index
      %c0_31 = arith.constant 0 : index
      %c0_32 = arith.constant 0 : index
      %38 = vector.load %arg7[%c0_30, %c0_31, %c0_32] : memref<1x8x1xf32, #tpu.memory_space<vmem>>, vector<1x8x1xf32>
      %39 = vector.shape_cast %38 : vector<1x8x1xf32> to vector<8x1xf32>
      %40 = arith.mulf %0, %0 : vector<8x1xf32>
      %cst_33 = arith.constant 6.400000e+01 : f32
      %41 = vector.broadcast %cst_33 : f32 to vector<8x1xf32>
      %42 = arith.mulf %41, %40 : vector<8x1xf32>
      %43 = arith.subf %39, %42 : vector<8x1xf32>
      %cst_34 = arith.constant 1.562500e-02 : f32
      %44 = vector.broadcast %cst_34 : f32 to vector<8x1xf32>
      %45 = arith.mulf %37, %44 : vector<8x1xf32>
      %cst_35 = arith.constant 1.562500e-02 : f32
      %46 = vector.broadcast %cst_35 : f32 to vector<8x1xf32>
      %47 = arith.mulf %43, %46 : vector<8x1xf32>
      %48 = arith.mulf %45, %45 : vector<8x1xf32>
      %49 = arith.subf %47, %48 : vector<8x1xf32>
      %c0_36 = arith.constant 0 : index
      %c0_37 = arith.constant 0 : index
      %c0_38 = arith.constant 0 : index
      %50 = vector.load %arg6[%c0_36, %c0_37, %c0_38] : memref<1x8x1xf32, #tpu.memory_space<vmem>>, vector<1x8x1xf32>
      %51 = vector.shape_cast %50 : vector<1x8x1xf32> to vector<8x1xf32>
      %52 = vector.shape_cast %45 : vector<8x1xf32> to vector<1x8x1xf32>
      tpu.vector_store %arg6[%c0_36, %c0_37, %c0_38], %52 {strides = array<i32>} : memref<1x8x1xf32, #tpu.memory_space<vmem>>, vector<1x8x1xf32>,
      %cst_39 = arith.constant 9.99999974E-6 : f32
      %53 = vector.broadcast %cst_39 : f32 to vector<8x1xf32>
      %54 = arith.addf %49, %53 : vector<8x1xf32>
      %55 = math.rsqrt %54 : vector<8x1xf32>
      %c0_40 = arith.constant 0 : index
      %c0_41 = arith.constant 0 : index
      %c0_42 = arith.constant 0 : index
      %56 = vector.load %arg7[%c0_40, %c0_41, %c0_42] : memref<1x8x1xf32, #tpu.memory_space<vmem>>, vector<1x8x1xf32>
      %57 = vector.shape_cast %56 : vector<1x8x1xf32> to vector<8x1xf32>
      %58 = vector.shape_cast %55 : vector<8x1xf32> to vector<1x8x1xf32>
      tpu.vector_store %arg7[%c0_40, %c0_41, %c0_42], %58 {strides = array<i32>} : memref<1x8x1xf32, #tpu.memory_space<vmem>>, vector<1x8x1xf32>,
    } else {
    }
    return
  }
  func.func @transform_0(%arg0: i32, %arg1: i32) -> (i32, i32, i32) {
    %c0_i32 = arith.constant 0 : i32
    %c0_i32_0 = arith.constant 0 : i32
    return %arg0, %c0_i32, %arg1 : i32, i32, i32
  }
  func.func @transform_1(%arg0: i32, %arg1: i32) -> (i32, i32) {
    %c0_i32 = arith.constant 0 : i32
    %c0_i32_0 = arith.constant 0 : i32
    %c0_i32_1 = arith.constant 0 : i32
    return %c0_i32, %c0_i32_0 : i32, i32
  }
  func.func @transform_2(%arg0: i32, %arg1: i32) -> (i32, i32) {
    %c0_i32 = arith.constant 0 : i32
    %c0_i32_0 = arith.constant 0 : i32
    %c0_i32_1 = arith.constant 0 : i32
    return %c0_i32, %c0_i32_0 : i32, i32
  }
  func.func @transform_3(%arg0: i32, %arg1: i32) -> (i32, i32, i32) {
    %c0_i32 = arith.constant 0 : i32
    %c0_i32_0 = arith.constant 0 : i32
    return %arg0, %c0_i32, %arg1 : i32, i32, i32
  }
  func.func @transform_4(%arg0: i32, %arg1: i32) -> (i32, i32, i32) {
    %c0_i32 = arith.constant 0 : i32
    %c0_i32_0 = arith.constant 0 : i32
    %c0_i32_1 = arith.constant 0 : i32
    return %arg0, %c0_i32, %c0_i32_0 : i32, i32, i32
  }
  func.func @transform_5(%arg0: i32, %arg1: i32) -> (i32, i32, i32) {
    %c0_i32 = arith.constant 0 : i32
    %c0_i32_0 = arith.constant 0 : i32
    %c0_i32_1 = arith.constant 0 : i32
    return %arg0, %c0_i32, %c0_i32_0 : i32, i32, i32
  }
}

module attributes {stable_mosaic.version = 11 : i64} {
  func.func @_final_kernel(%arg0: i32, %arg1: i32, %arg2: memref<1x8x128xf32, #tpu.memory_space<vmem>>, %arg3: memref<1x8x1xf32, #tpu.memory_space<vmem>>, %arg4: memref<1x8x1xf32, #tpu.memory_space<vmem>>, %arg5: memref<8x1xf32, #tpu.memory_space<vmem>>, %arg6: memref<8x1xf32, #tpu.memory_space<vmem>>, %arg7: memref<1x8x128xf32, #tpu.memory_space<vmem>>, %arg8: memref<1x8x1xf32, #tpu.memory_space<vmem>>, %arg9: memref<1x8x1xf32, #tpu.memory_space<vmem>>, %arg10: memref<8x1xf32, #tpu.memory_space<vmem>>, %arg11: memref<8x1xf32, #tpu.memory_space<vmem>>, %arg12: memref<1x8x128xf32, #tpu.memory_space<vmem>>) attributes {dimension_semantics = [#tpu.dimension_semantics<parallel>, #tpu.dimension_semantics<parallel>], iteration_bounds = array<i64: 2, 1>, scalar_prefetch = 0 : i64, scratch_operands = 0 : i64, tpu.core_type = #tpu.core_type<tc>, window_params = [{transform_indices = @transform_0, window_bounds = array<i64: 1, 8, 128>}, {transform_indices = @transform_1, window_bounds = array<i64: 1, 8, 1>}, {transform_indices = @transform_2, window_bounds = array<i64: 1, 8, 1>}, {pipeline_mode = #tpu.pipeline_mode<synchronous>, transform_indices = @transform_3, window_bounds = array<i64: 8, 1>}, {pipeline_mode = #tpu.pipeline_mode<synchronous>, transform_indices = @transform_4, window_bounds = array<i64: 8, 1>}, {transform_indices = @transform_5, window_bounds = array<i64: 1, 8, 128>}, {transform_indices = @transform_6, window_bounds = array<i64: 1, 8, 1>}, {transform_indices = @transform_7, window_bounds = array<i64: 1, 8, 1>}, {pipeline_mode = #tpu.pipeline_mode<synchronous>, transform_indices = @transform_8, window_bounds = array<i64: 8, 1>}, {pipeline_mode = #tpu.pipeline_mode<synchronous>, transform_indices = @transform_9, window_bounds = array<i64: 8, 1>}, {transform_indices = @transform_10, window_bounds = array<i64: 1, 8, 128>}]} {
    %c0 = arith.constant 0 : index
    %c0_0 = arith.constant 0 : index
    %c0_1 = arith.constant 0 : index
    %0 = vector.load %arg2[%c0, %c0_0, %c0_1] : memref<1x8x128xf32, #tpu.memory_space<vmem>>, vector<1x8x128xf32>
    %1 = vector.shape_cast %0 : vector<1x8x128xf32> to vector<8x128xf32>
    %c0_2 = arith.constant 0 : index
    %c0_3 = arith.constant 0 : index
    %c0_4 = arith.constant 0 : index
    %2 = vector.load %arg3[%c0_2, %c0_3, %c0_4] : memref<1x8x1xf32, #tpu.memory_space<vmem>>, vector<1x8x1xf32>
    %3 = vector.shape_cast %2 : vector<1x8x1xf32> to vector<8x1xf32>
    %4 = vector.broadcast %3 : vector<8x1xf32> to vector<8x128xf32>
    %5 = arith.subf %1, %4 : vector<8x128xf32>
    %c0_5 = arith.constant 0 : index
    %c0_6 = arith.constant 0 : index
    %c0_7 = arith.constant 0 : index
    %6 = vector.load %arg4[%c0_5, %c0_6, %c0_7] : memref<1x8x1xf32, #tpu.memory_space<vmem>>, vector<1x8x1xf32>
    %7 = vector.shape_cast %6 : vector<1x8x1xf32> to vector<8x1xf32>
    %c0_8 = arith.constant 0 : index
    %c0_9 = arith.constant 0 : index
    %8 = vector.load %arg5[%c0_8, %c0_9] : memref<8x1xf32, #tpu.memory_space<vmem>>, vector<8x1xf32>
    %9 = arith.mulf %7, %8 : vector<8x1xf32>
    %10 = vector.broadcast %9 : vector<8x1xf32> to vector<8x128xf32>
    %11 = arith.mulf %5, %10 : vector<8x128xf32>
    %c0_10 = arith.constant 0 : index
    %c0_11 = arith.constant 0 : index
    %12 = vector.load %arg6[%c0_10, %c0_11] : memref<8x1xf32, #tpu.memory_space<vmem>>, vector<8x1xf32>
    %13 = vector.broadcast %12 : vector<8x1xf32> to vector<8x128xf32>
    %14 = arith.addf %11, %13 : vector<8x128xf32>
    %c0_12 = arith.constant 0 : index
    %c0_13 = arith.constant 0 : index
    %c0_14 = arith.constant 0 : index
    %15 = vector.load %arg7[%c0_12, %c0_13, %c0_14] : memref<1x8x128xf32, #tpu.memory_space<vmem>>, vector<1x8x128xf32>
    %16 = vector.shape_cast %15 : vector<1x8x128xf32> to vector<8x128xf32>
    %c0_15 = arith.constant 0 : index
    %c0_16 = arith.constant 0 : index
    %c0_17 = arith.constant 0 : index
    %17 = vector.load %arg8[%c0_15, %c0_16, %c0_17] : memref<1x8x1xf32, #tpu.memory_space<vmem>>, vector<1x8x1xf32>
    %18 = vector.shape_cast %17 : vector<1x8x1xf32> to vector<8x1xf32>
    %19 = vector.broadcast %18 : vector<8x1xf32> to vector<8x128xf32>
    %20 = arith.subf %16, %19 : vector<8x128xf32>
    %c0_18 = arith.constant 0 : index
    %c0_19 = arith.constant 0 : index
    %c0_20 = arith.constant 0 : index
    %21 = vector.load %arg9[%c0_18, %c0_19, %c0_20] : memref<1x8x1xf32, #tpu.memory_space<vmem>>, vector<1x8x1xf32>
    %22 = vector.shape_cast %21 : vector<1x8x1xf32> to vector<8x1xf32>
    %c0_21 = arith.constant 0 : index
    %c0_22 = arith.constant 0 : index
    %23 = vector.load %arg10[%c0_21, %c0_22] : memref<8x1xf32, #tpu.memory_space<vmem>>, vector<8x1xf32>
    %24 = arith.mulf %22, %23 : vector<8x1xf32>
    %25 = vector.broadcast %24 : vector<8x1xf32> to vector<8x128xf32>
    %26 = arith.mulf %20, %25 : vector<8x128xf32>
    %c0_23 = arith.constant 0 : index
    %c0_24 = arith.constant 0 : index
    %27 = vector.load %arg11[%c0_23, %c0_24] : memref<8x1xf32, #tpu.memory_space<vmem>>, vector<8x1xf32>
    %28 = vector.broadcast %27 : vector<8x1xf32> to vector<8x128xf32>
    %29 = arith.addf %26, %28 : vector<8x128xf32>
    %30 = arith.addf %14, %29 : vector<8x128xf32>
    %cst = arith.constant 0.000000e+00 : f32
    %31 = vector.broadcast %cst : f32 to vector<8x128xf32>
    %32 = arith.cmpf oge, %30, %31 : vector<8x128xf32>
    %cst_25 = arith.constant 0.00999999977 : f32
    %33 = vector.broadcast %cst_25 : f32 to vector<8x128xf32>
    %34 = arith.mulf %33, %30 : vector<8x128xf32>
    %35 = arith.select %32, %30, %34 : vector<8x128xi1>, vector<8x128xf32>
    %c0_26 = arith.constant 0 : index
    %c0_27 = arith.constant 0 : index
    %c0_28 = arith.constant 0 : index
    %36 = vector.load %arg12[%c0_26, %c0_27, %c0_28] : memref<1x8x128xf32, #tpu.memory_space<vmem>>, vector<1x8x128xf32>
    %37 = vector.shape_cast %36 : vector<1x8x128xf32> to vector<8x128xf32>
    %38 = vector.shape_cast %35 : vector<8x128xf32> to vector<1x8x128xf32>
    tpu.vector_store %arg12[%c0_26, %c0_27, %c0_28], %38 {strides = array<i32>} : memref<1x8x128xf32, #tpu.memory_space<vmem>>, vector<1x8x128xf32>,
    return
  }
  func.func @transform_0(%arg0: i32, %arg1: i32) -> (i32, i32, i32) {
    %c0_i32 = arith.constant 0 : i32
    %c0_i32_0 = arith.constant 0 : i32
    return %arg0, %c0_i32, %arg1 : i32, i32, i32
  }
  func.func @transform_1(%arg0: i32, %arg1: i32) -> (i32, i32, i32) {
    %c0_i32 = arith.constant 0 : i32
    %c0_i32_0 = arith.constant 0 : i32
    %c0_i32_1 = arith.constant 0 : i32
    return %arg0, %c0_i32, %c0_i32_0 : i32, i32, i32
  }
  func.func @transform_2(%arg0: i32, %arg1: i32) -> (i32, i32, i32) {
    %c0_i32 = arith.constant 0 : i32
    %c0_i32_0 = arith.constant 0 : i32
    %c0_i32_1 = arith.constant 0 : i32
    return %arg0, %c0_i32, %c0_i32_0 : i32, i32, i32
  }
  func.func @transform_3(%arg0: i32, %arg1: i32) -> (i32, i32) {
    %c0_i32 = arith.constant 0 : i32
    %c0_i32_0 = arith.constant 0 : i32
    %c0_i32_1 = arith.constant 0 : i32
    return %c0_i32, %c0_i32_0 : i32, i32
  }
  func.func @transform_4(%arg0: i32, %arg1: i32) -> (i32, i32) {
    %c0_i32 = arith.constant 0 : i32
    %c0_i32_0 = arith.constant 0 : i32
    %c0_i32_1 = arith.constant 0 : i32
    return %c0_i32, %c0_i32_0 : i32, i32
  }
  func.func @transform_5(%arg0: i32, %arg1: i32) -> (i32, i32, i32) {
    %c0_i32 = arith.constant 0 : i32
    %c0_i32_0 = arith.constant 0 : i32
    return %arg0, %c0_i32, %arg1 : i32, i32, i32
  }
  func.func @transform_6(%arg0: i32, %arg1: i32) -> (i32, i32, i32) {
    %c0_i32 = arith.constant 0 : i32
    %c0_i32_0 = arith.constant 0 : i32
    %c0_i32_1 = arith.constant 0 : i32
    return %arg0, %c0_i32, %c0_i32_0 : i32, i32, i32
  }
  func.func @transform_7(%arg0: i32, %arg1: i32) -> (i32, i32, i32) {
    %c0_i32 = arith.constant 0 : i32
    %c0_i32_0 = arith.constant 0 : i32
    %c0_i32_1 = arith.constant 0 : i32
    return %arg0, %c0_i32, %c0_i32_0 : i32, i32, i32
  }
  func.func @transform_8(%arg0: i32, %arg1: i32) -> (i32, i32) {
    %c0_i32 = arith.constant 0 : i32
    %c0_i32_0 = arith.constant 0 : i32
    %c0_i32_1 = arith.constant 0 : i32
    return %c0_i32, %c0_i32_0 : i32, i32
  }
  func.func @transform_9(%arg0: i32, %arg1: i32) -> (i32, i32) {
    %c0_i32 = arith.constant 0 : i32
    %c0_i32_0 = arith.constant 0 : i32
    %c0_i32_1 = arith.constant 0 : i32
    return %c0_i32, %c0_i32_0 : i32, i32
  }
  func.func @transform_10(%arg0: i32, %arg1: i32) -> (i32, i32, i32) {
    %c0_i32 = arith.constant 0 : i32
    %c0_i32_0 = arith.constant 0 : i32
    return %arg0, %c0_i32, %arg1 : i32, i32, i32
  }
}

</mosaic_0001>

<bundles_post_ra>
// kernel: unet_res_block.6
= control target key start
LH: loop header
LB: loop body
LE: loop exit
PB: predicated region body
PF: predicated region fallthrough
CT: control target
= control target key end

     0   :  { %s505_s18 = smov 0   ;;  %s507_s19 = smov 0   ;;  %s550_s0 = inlined_call_operand.vmem [shape: f32[2,8,128], index: 0, kind: input, shape index: {}]   ;;  %s551_s1 = inlined_call_operand.vmem [shape: f32[2,8,1], index: 1, kind: input, shape index: {}]   ;;  %s552_s2 = inlined_call_operand.vmem [shape: f32[2,8,1], index: 2, kind: input, shape index: {}]   ;;  %s553_s3 = inlined_call_operand.vmem [shape: f32[8,1], index: 3, kind: input, shape index: {}]   ;;  %s554_s4 = inlined_call_operand.vmem [shape: f32[8,1], index: 4, kind: input, shape index: {}]   ;;  %s555_s5 = inlined_call_operand.vmem [shape: bf16[2,8,128], index: 5, kind: output, shape index: {}]  }
   0x1   :  { %s509_s20 = smov 0  }
   0x2 LB: > { %s27_s21 = sadd.s32 1, %s468_s19  ;;  %p416_p0 = scmp.ge.s32.totalorder %s472_s20, 1  ;;  %s472_s20 = sphi %s509_s20, %s15_s20   ;;  %s468_s19 = sphi %s507_s19, %s557_s19   ;;  %s464_s18 = sphi %s505_s18, %s556_s18  }
   0x3   : > { %p29_p1 = scmp.ge.s32.totalorder %s27_s21, 2  ;;  %p223_p2 = scmp.lt.s32.totalorder %s472_s20, 3 }
   0x5   : > { %s559_s21 = smov (%p29_p1, %s27_s21), 0  ;;  %p224_p3 = pnand %p416_p0, %p223_p2 }
   0x6   : > { %p263_p4 = scmp.lt.s32.totalorder (!%p224_p3), %s464_s18, 1  ;;  %v302_v0 = vld [vmem:[%s554_s4] sm:$0xff] (!%p224_p3)  ;;  %v474_v1 = vmov (!%p224_p3), 0  }
   0x7   : > { %227 = sbr.rel (%p224_p3) target bundleno = 160 (0xa0), region = 40  ;;  %448 = vset.pattern.permute.xlu0 (!%p224_p3), %v474_v1  ;;  %449 = vset.pattern.permute.xlu1 (!%p224_p3), %v474_v1  ;;  %v294_v2 = vld [vmem:[%s553_s3] sm:$0xff] (!%p224_p3) }
   0x8   : > { %305 = vperm.xlu1 (!%p224_p3), %449, %v302_v0  }
   0xe   : > { %s561_s18 = smov (!%p263_p4, %s464_s18), 1 }
   0xf   : > { %s417_s24 = sshll.u32 %s561_s18, 3  ;;  %s420_s11 = sshll.u32 %s561_s18, 2 }
  0x10   : > { %s273_s27 = scalar_lea.vmem %s551_s1, %s417_s24  ;;  %s277_s7 = scalar_lea.vmem %s552_s2, %s417_s24 }
  0x11   : > { %v286_v3 = vld [vmem:[%s273_s27] sm:$0xff]  ;;  %s269_s10 = scalar_lea.vmem %s550_s0, %s417_s24  ;;  %s284_s14 = scalar_lea.vmem %s555_s5, %s420_s11 }
  0x12   : > { %289 = vperm.xlu0 %448, %v286_v3   ;;  %v293_v4 = vld [vmem:[%s277_s7] sm:$0xff] }
  0x13   : > { %v295_v5 = vmul.f32 %v294_v2, %v293_v4  ;;  %v285_v7 = vld [vmem:[%s269_s10] sm:$0xff] }
  0x16   : > { %298 = vperm.xlu0 %448, %v295_v5  }
  0x87   : > { %v306_v10 = vpop.permute.xlu1 %305 }
  0x91   : > { %v290_v6 = vpop.permute.xlu0 %289 }
  0x92   : > { %v292_v8 = vsub.f32 %v285_v7, %v290_v6 }
  0x95   : > { %v299_v9 = vpop.permute.xlu0 %298 }
  0x96   : > { %v301_v11 = vmul.f32 %v299_v9, %v292_v8 }
  0x98   : > { %v308_v12 = vadd.f32 %v306_v10, %v301_v11 }
  0x9a   : > { %vm309_vm0 = vcmp.ge.f32.partialorder %v308_v12, 0.0  ;;  %v310_v13 = vmul.f32 0.01, %v308_v12 }
  0x9c   : > { %v311_v14 = vsel %vm309_vm0, %v308_v12, %v310_v13 }
  0x9d   : > { %v312_v15 = vpack.c.bf16 %v311_v14, %v311_v14 }
  0x9f   : > { %313 = vst [vmem:[%s284_s14] sm:$0xf] %v312_v15 }
  0xa0 PF: > { %s15_s20 = sadd.s32 1, %s472_s20   ;;  %s556_s18 = smov %s468_s19 }
  0xa1   : > { %p12_p5 = scmp.ge.s32.totalorder %s15_s20, 4   ;;  %s557_s19 = smov %s559_s21 }
  0xa3   :  { %14 = sbr.rel (!%p12_p5) target bundleno = 2 (0x2), region = 76 }

// kernel: unet_res_block.5
= control target key start
LH: loop header
LB: loop body
LE: loop exit
PB: predicated region body
PF: predicated region fallthrough
CT: control target
= control target key end

     0   :  { %s709_s18 = smov 0   ;;  %s711_s19 = smov 0   ;;  %s771_s0 = inlined_call_operand.vmem [shape: bf16[2,128,128], index: 0, kind: input, shape index: {}]   ;;  %s772_s1 = inlined_call_operand.vmem [shape: bf16[8,128], index: 1, kind: input, shape index: {}]   ;;  %s773_s2 = inlined_call_operand.vmem [shape: f32[8,1], index: 2, kind: input, shape index: {}]   ;;  %s774_s3 = inlined_call_operand.vmem [shape: f32[2,8,128], index: 3, kind: output, shape index: {0}]   ;;  %s775_s4 = inlined_call_operand.vmem [shape: f32[2,8,1], index: 4, kind: output, shape index: {1}]   ;;  %s776_s5 = inlined_call_operand.vmem [shape: f32[2,8,1], index: 5, kind: output, shape index: {2}]  }
   0x1   :  { %s713_s20 = smov 0  }
   0x2 LB: > { %s28_s21 = sadd.s32 1, %s670_s19  ;;  %p568_p0 = scmp.ge.s32.totalorder %s674_s20, 1  ;;  %s674_s20 = sphi %s713_s20, %s16_s20   ;;  %s670_s19 = sphi %s711_s19, %s778_s19   ;;  %s666_s18 = sphi %s709_s18, %s777_s18  }
   0x3   : > { %p30_p1 = scmp.ge.s32.totalorder %s28_s21, 2  ;;  %p211_p2 = scmp.lt.s32.totalorder %s674_s20, 3 }
   0x5   : > { %s780_s21 = smov (%p30_p1, %s28_s21), 0  ;;  %p212_p3 = pnand %p568_p0, %p211_p2 }
   0x6   : > { %p252_p4 = scmp.lt.s32.totalorder (!%p212_p3), %s666_s18, 1  ;;  %v676_v0 = vmov (!%p212_p3), 0.0   ;;  %vm677_vm0 = vmmov (!%p212_p3), 0   ;;  %v276_v1 = vld [vmem:[%s773_s2] sm:$0xff] (!%p212_p3)  ;;  %v678_v2 = vmov (!%p212_p3), 0   ;;  %vm392_vm1 = vcmask (!%p212_p3), 7168  }
   0x7   : > { %215 = sbr.rel (%p212_p3) target bundleno = 437 (0x1b5), region = 32  ;;  %594 = vmatprep.subr.bf16.mxu0 (!%p212_p3), %v676_v0  ;;  %610 = vmatprep.mubr.msk.bf16.mxu0 (!%p212_p3), %vm677_vm0, %v676_v0  ;;  %v277_v11 = vld [vmem:[%s772_s1] sm:$0xf] (!%p212_p3)  ;;  %v414_v25 = vmul.f32 (!%p212_p3), %v276_v1, %v276_v1  ;;  %v411_v26 = vmul.f32 (!%p212_p3), 64.0, %v276_v1 }
   0x8   : > { %641 = vset.pattern.permute.xlu0 (!%p212_p3), %v678_v2 }
   0x9   : > { %296 = vperm.xlu0 (!%p212_p3), %641, %v276_v1   ;;  %v415_v27 = vmul.f32 (!%p212_p3), 64.0, %v414_v25 }
   0xe   : > { %s782_s18 = smov (!%p252_p4, %s666_s18), 1 }
   0xf   : > { %s584_s24 = sshll.u32 %s782_s18, 6  ;;  %s571_s30 = sshll.u32 %s782_s18, 3 }
  0x10   : > { %s259_s27 = scalar_lea.vmem %s771_s0, %s584_s24  ;;  %s743_s8 = scalar_lea.vmem %s775_s4, %s571_s30 }
  0x11   : > { %v642_v3 = vld [vmem:[%s259_s27] sm:$0xff]   ;;  %v643_v4 = vld [vmem:[%s259_s27 + $0x8] sm:$0xff]   ;;  %v644_v5 = vld [vmem:[%s259_s27 + $0x10] sm:$0xff]   ;;  %393 = vst.msk [vmem:[%s743_s8] sm:$0xff] %vm392_vm1, %v676_v0  ;;  %s266_s11 = scalar_lea.vmem %s774_s3, %s571_s30  ;;  %s274_s14 = scalar_lea.vmem %s776_s5, %s571_s30 }
  0x12   : > { %595 = vmatpush3.bf16.msra.mxu0 %v642_v3  ;;  %v645_v6 = vld [vmem:[%s259_s27 + $0x18] sm:$0xff]   ;;  %v646_v7 = vld [vmem:[%s259_s27 + $0x20] sm:$0xff]   ;;  %v647_v8 = vld [vmem:[%s259_s27 + $0x28] sm:$0xff]   ;;  %394 = vst.msk [vmem:[%s274_s14] sm:$0xff] %vm392_vm1, %v676_v0 }
  0x13   : > { %596 = vmatprep.subr.bf16.mxu0 %v676_v0  ;;  %v648_v9 = vld [vmem:[%s259_s27 + $0x30] sm:$0xff]   ;;  %v649_v10 = vld [vmem:[%s259_s27 + $0x38] sm:$0xff]  }
  0x16   : > { %597 = vmatpush3.bf16.msra.mxu0 %v643_v4 }
  0x17   : > { %598 = vmatprep.subr.bf16.mxu0 %v676_v0 }
  0x18   : > { %v395_v19 = vld [vmem:[%s743_s8] sm:$0xff] }
  0x19   : > { %v401_v21 = vld [vmem:[%s274_s14] sm:$0xff] }
  0x1a   : > { %599 = vmatpush3.bf16.msra.mxu0 %v644_v5 }
  0x1b   : > { %600 = vmatprep.subr.bf16.mxu0 %v676_v0 }
  0x1e   : > { %601 = vmatpush3.bf16.msra.mxu0 %v645_v6 }
  0x1f   : > { %602 = vmatprep.subr.bf16.mxu0 %v676_v0 }
  0x22   : > { %603 = vmatpush3.bf16.msra.mxu0 %v646_v7 }
  0x23   : > { %604 = vmatprep.subr.bf16.mxu0 %v676_v0 }
  0x26   : > { %605 = vmatpush3.bf16.msra.mxu0 %v647_v8 }
  0x27   : > { %606 = vmatprep.subr.bf16.mxu0 %v676_v0 }
  0x2a   : > { %607 = vmatpush3.bf16.msra.mxu0 %v648_v9 }
  0x2b   : > { %608 = vmatprep.subr.bf16.mxu0 %v676_v0 }
  0x2e   : > { %609 = vmatpush3.bf16.msra.mxu0 %v649_v10 }
  0x31   : > { %611 = vmatmul.mubr.bf16.vlgmr.msra.gmra.mrb[0].mxu0 %v277_v11 }
  0x88   : > { %v297_v12 = vpop.permute.xlu0 %296 }
 0x104   : > { %v381_v13 = vpop.f32.mrb[0].mxu0 }
 0x105   : > { %v382_v14 = vadd.f32 %v381_v13, %v297_v12  ;;  %v612_v15 = vpop.f32.mrb[1].mxu0 }
 0x106   : > { %v384_v16 = vpop.f32.mrb[2].mxu0 }
 0x107   : > { %387 = vst [vmem:[%s266_s11] sm:$0xff] %v382_v14  ;;  %396 = vadd.xlane.f32.xlu0 %v382_v14  ;;  %v613_v17 = vpop.f32.mrb[3].mxu0  ;;  %v402_v18 = vmul.f32 %v382_v14, %v382_v14 }
 0x109   : > { %403 = vadd.xlane.f32.xlu1 %v402_v18 }
 0x194   : > { %v397_v20 = vpop.xlane.xlu0 %396 }
 0x195   : > { %v398_v22 = vadd.f32 %v397_v20, %v395_v19 }
 0x196   : > { %v404_v23 = vpop.xlane.xlu1 %403 }
 0x197   : > { %400 = vst.msk [vmem:[%s743_s8] sm:$0xff] %vm392_vm1, %v398_v22  ;;  %v405_v24 = vadd.f32 %v404_v23, %v401_v21 }
 0x199   : > { %406 = vst.msk [vmem:[%s274_s14] sm:$0xff] %vm392_vm1, %v405_v24 }
 0x19e   : > { %v410_v28 = vld [vmem:[%s743_s8] sm:$0xff] }
 0x19f   : > { %v412_v29 = vsub.f32 %v410_v28, %v411_v26 }
 0x1a0   : > { %v413_v30 = vld [vmem:[%s274_s14] sm:$0xff] }
 0x1a1   : > { %v417_v31 = vmul.f32 0.015625, %v412_v29  ;;  %v416_v32 = vsub.f32 %v413_v30, %v415_v27 }
 0x1a3   : > { %v419_v33 = vmul.f32 %v417_v31, %v417_v31  ;;  %421 = vst.msk [vmem:[%s743_s8] sm:$0xff] %vm392_vm1, %v417_v31  ;;  %v418_v34 = vmul.f32 0.015625, %v416_v32 }
 0x1a5   : > { %v420_v35 = vsub.f32 %v418_v34, %v419_v33 }
 0x1a7   : > { %v422_v36 = vadd.f32 1e-05, %v420_v35 }
 0x1a9   : > { %650 = vrsqrt.f32 %v422_v36 }
 0x1b3   : > { %v651_v37 = vpop.eup %650 }
 0x1b4   : > { %424 = vst.msk [vmem:[%s274_s14] sm:$0xff] %vm392_vm1, %v651_v37 }
 0x1b5 PF: > { %s16_s20 = sadd.s32 1, %s674_s20   ;;  %s777_s18 = smov %s670_s19 }
 0x1b6   : > { %p13_p5 = scmp.ge.s32.totalorder %s16_s20, 4   ;;  %s778_s19 = smov %s780_s21 }
 0x1b8   :  { %15 = sbr.rel (!%p13_p5) target bundleno = 2 (0x2), region = 94 }

// kernel: unet_res_block.7
= control target key start
LH: loop header
LB: loop body
LE: loop exit
PB: predicated region body
PF: predicated region fallthrough
CT: control target
= control target key end

     0   :  { %s791_s18 = smov 0   ;;  %s793_s19 = smov 0   ;;  %s859_s0 = inlined_call_operand.vmem [shape: bf16[2,256,128], index: 0, kind: input, shape index: {}]   ;;  %s860_s1 = inlined_call_operand.vmem [shape: bf16[8,256], index: 1, kind: input, shape index: {}]   ;;  %s861_s2 = inlined_call_operand.vmem [shape: f32[8,1], index: 2, kind: input, shape index: {}]   ;;  %s862_s3 = inlined_call_operand.vmem [shape: f32[2,8,128], index: 3, kind: output, shape index: {0}]   ;;  %s863_s4 = inlined_call_operand.vmem [shape: f32[2,8,1], index: 4, kind: output, shape index: {1}]   ;;  %s864_s5 = inlined_call_operand.vmem [shape: f32[2,8,1], index: 5, kind: output, shape index: {2}]  }
   0x1   :  { %s795_s20 = smov 0  }
   0x2 LB: > { %s28_s21 = sadd.s32 1, %s753_s19  ;;  %p639_p0 = scmp.ge.s32.totalorder %s757_s20, 1  ;;  %s757_s20 = sphi %s795_s20, %s16_s20   ;;  %s753_s19 = sphi %s793_s19, %s866_s19   ;;  %s749_s18 = sphi %s791_s18, %s865_s18  }
   0x3   : > { %p30_p1 = scmp.ge.s32.totalorder %s28_s21, 2  ;;  %p211_p2 = scmp.lt.s32.totalorder %s757_s20, 3 }
   0x5   : > { %s868_s21 = smov (%p30_p1, %s28_s21), 0  ;;  %p212_p3 = pnand %p639_p0, %p211_p2 }
   0x6   : > { %p252_p4 = scmp.lt.s32.totalorder (!%p212_p3), %s749_s18, 1  ;;  %v277_v0 = vld [vmem:[%s860_s1] sm:$0xff] (!%p212_p3)  ;;  %v759_v3 = vmov (!%p212_p3), 0   ;;  %vm463_vm0 = vcmask (!%p212_p3), 7168   ;;  %v760_v21 = vmov (!%p212_p3), 0.0  }
   0x7   : > { %215 = sbr.rel (%p212_p3) target bundleno = 441 (0x1b9), region = 32  ;;  %v815_v1 = vld [vmem:[%s861_s2] sm:$0xff] (!%p212_p3)  ;;  %v646_v2 = vcombine.high (!%p212_p3), %v277_v0, %v277_v0  ;;  %714 = vset.pattern.permute.xlu0 (!%p212_p3), %v759_v3  ;;  %v645_v20 = vcombine.low (!%p212_p3), %v277_v0, %v277_v0 }
   0x8   : > { %312 = vperm.xlu0 (!%p212_p3), %714, %v815_v1   ;;  %v485_v36 = vmul.f32 (!%p212_p3), %v815_v1, %v815_v1  ;;  %v482_v37 = vmul.f32 (!%p212_p3), 64.0, %v815_v1 }
   0x9   : > { %450 = vmatprep.mubr.bf16.mxu0 (!%p212_p3), %v646_v2 }
   0xa   : > { %v486_v38 = vmul.f32 (!%p212_p3), 64.0, %v485_v36 }
   0xe   : > { %s870_s18 = smov (!%p252_p4, %s749_s18), 1 }
   0xf   : > { %s665_s26 = sshll.u32 %s870_s18, 7  ;;  %s642_s30 = sshll.u32 %s870_s18, 3 }
  0x10   : > { %s259_s29 = scalar_lea.vmem %s859_s0, %s665_s26  ;;  %s828_s8 = scalar_lea.vmem %s863_s4, %s642_s30 }
  0x11   : > { %v715_v4 = vld [vmem:[%s259_s29 + $0x40] sm:$0xff]   ;;  %v717_v6 = vld [vmem:[%s259_s29 + $0x48] sm:$0xff]   ;;  %v719_v8 = vld [vmem:[%s259_s29 + $0x50] sm:$0xff]   ;;  %464 = vst.msk [vmem:[%s828_s8] sm:$0xff] %vm463_vm0, %v760_v21  ;;  %s266_s11 = scalar_lea.vmem %s862_s3, %s642_s30  ;;  %s274_s14 = scalar_lea.vmem %s864_s5, %s642_s30 }
  0x12   : > { %v716_v5 = vld [vmem:[%s259_s29] sm:$0xff]   ;;  %666 = vmatprep.subr.bf16.mxu0 %v715_v4  ;;  %v718_v7 = vld [vmem:[%s259_s29 + $0x8] sm:$0xff]   ;;  %v720_v9 = vld [vmem:[%s259_s29 + $0x10] sm:$0xff]   ;;  %465 = vst.msk [vmem:[%s274_s14] sm:$0xff] %vm463_vm0, %v760_v21 }
  0x13   : > { %667 = vmatpush3.bf16.msra.mxu0 %v716_v5  ;;  %v721_v10 = vld [vmem:[%s259_s29 + $0x58] sm:$0xff]   ;;  %v723_v12 = vld [vmem:[%s259_s29 + $0x60] sm:$0xff]   ;;  %v725_v14 = vld [vmem:[%s259_s29 + $0x68] sm:$0xff]  }
  0x14   : > { %668 = vmatprep.subr.bf16.mxu0 %v717_v6  ;;  %v722_v11 = vld [vmem:[%s259_s29 + $0x18] sm:$0xff]   ;;  %v724_v13 = vld [vmem:[%s259_s29 + $0x20] sm:$0xff]   ;;  %v726_v15 = vld [vmem:[%s259_s29 + $0x28] sm:$0xff]  }
  0x15   : > { %v727_v16 = vld [vmem:[%s259_s29 + $0x70] sm:$0xff]   ;;  %v729_v18 = vld [vmem:[%s259_s29 + $0x78] sm:$0xff]  }
  0x16   : > { %v728_v17 = vld [vmem:[%s259_s29 + $0x30] sm:$0xff]   ;;  %v730_v19 = vld [vmem:[%s259_s29 + $0x38] sm:$0xff]  }
  0x17   : > { %669 = vmatpush3.bf16.msra.mxu0 %v718_v7 }
  0x18   : > { %670 = vmatprep.subr.bf16.mxu0 %v719_v8  ;;  %v466_v30 = vld [vmem:[%s828_s8] sm:$0xff] }
  0x19   : > { %v472_v32 = vld [vmem:[%s274_s14] sm:$0xff] }
  0x1b   : > { %671 = vmatpush3.bf16.msra.mxu0 %v720_v9 }
  0x1c   : > { %672 = vmatprep.subr.bf16.mxu0 %v721_v10 }
  0x1f   : > { %673 = vmatpush3.bf16.msra.mxu0 %v722_v11 }
  0x20   : > { %674 = vmatprep.subr.bf16.mxu0 %v723_v12 }
  0x23   : > { %675 = vmatpush3.bf16.msra.mxu0 %v724_v13 }
  0x24   : > { %676 = vmatprep.subr.bf16.mxu0 %v725_v14 }
  0x27   : > { %677 = vmatpush3.bf16.msra.mxu0 %v726_v15 }
  0x28   : > { %678 = vmatprep.subr.bf16.mxu0 %v727_v16 }
  0x2b   : > { %679 = vmatpush3.bf16.msra.mxu0 %v728_v17 }
  0x2c   : > { %680 = vmatprep.subr.bf16.mxu0 %v729_v18 }
  0x2f   : > { %681 = vmatpush3.bf16.msra.mxu0 %v730_v19 }
  0x32   : > { %451 = vmatmul.mubr.bf16.vlgmr.msra.gmra.mrb[0].mxu0 %v645_v20 }
  0x87   : > { %v313_v24 = vpop.permute.xlu0 %312 }
 0x105   : > { %v682_v22 = vpop.f32.mrb[0].mxu0 }
 0x106   : > { %v683_v23 = vpop.f32.mrb[1].mxu0 }
 0x107   : > { %v684_v25 = vadd.f32 %v683_v23, %v682_v22  ;;  %v685_v26 = vpop.f32.mrb[2].mxu0 }
 0x108   : > { %v686_v27 = vpop.f32.mrb[3].mxu0 }
 0x109   : > { %v453_v28 = vadd.f32 %v684_v25, %v313_v24 }
 0x10b   : > { %458 = vst [vmem:[%s266_s11] sm:$0xff] %v453_v28  ;;  %467 = vadd.xlane.f32.xlu0 %v453_v28  ;;  %v473_v29 = vmul.f32 %v453_v28, %v453_v28 }
 0x10d   : > { %474 = vadd.xlane.f32.xlu1 %v473_v29 }
 0x198   : > { %v468_v31 = vpop.xlane.xlu0 %467 }
 0x199   : > { %v469_v33 = vadd.f32 %v468_v31, %v466_v30 }
 0x19a   : > { %v475_v34 = vpop.xlane.xlu1 %474 }
 0x19b   : > { %471 = vst.msk [vmem:[%s828_s8] sm:$0xff] %vm463_vm0, %v469_v33  ;;  %v476_v35 = vadd.f32 %v475_v34, %v472_v32 }
 0x19d   : > { %477 = vst.msk [vmem:[%s274_s14] sm:$0xff] %vm463_vm0, %v476_v35 }
 0x1a2   : > { %v481_v39 = vld [vmem:[%s828_s8] sm:$0xff] }
 0x1a3   : > { %v483_v40 = vsub.f32 %v481_v39, %v482_v37 }
 0x1a4   : > { %v484_v41 = vld [vmem:[%s274_s14] sm:$0xff] }
 0x1a5   : > { %v488_v42 = vmul.f32 0.015625, %v483_v40  ;;  %v487_v43 = vsub.f32 %v484_v41, %v486_v38 }
 0x1a7   : > { %v490_v44 = vmul.f32 %v488_v42, %v488_v42  ;;  %492 = vst.msk [vmem:[%s828_s8] sm:$0xff] %vm463_vm0, %v488_v42  ;;  %v489_v45 = vmul.f32 0.015625, %v487_v43 }
 0x1a9   : > { %v491_v46 = vsub.f32 %v489_v45, %v490_v44 }
 0x1ab   : > { %v493_v47 = vadd.f32 1e-05, %v491_v46 }
 0x1ad   : > { %733 = vrsqrt.f32 %v493_v47 }
 0x1b7   : > { %v734_v48 = vpop.eup %733 }
 0x1b8   : > { %495 = vst.msk [vmem:[%s274_s14] sm:$0xff] %vm463_vm0, %v734_v48 }
 0x1b9 PF: > { %s16_s20 = sadd.s32 1, %s757_s20   ;;  %s865_s18 = smov %s753_s19 }
 0x1ba   : > { %p13_p5 = scmp.ge.s32.totalorder %s16_s20, 4   ;;  %s866_s19 = smov %s868_s21 }
 0x1bc   :  { %15 = sbr.rel (!%p13_p5) target bundleno = 2 (0x2), region = 94 }

// kernel: unet_res_block.8
= control target key start
LH: loop header
LB: loop body
LE: loop exit
PB: predicated region body
PF: predicated region fallthrough
CT: control target
= control target key end

     0   :  { %s610_s18 = smov 0   ;;  %s612_s19 = smov 0   ;;  %s675_s0 = inlined_call_operand.vmem [shape: bf16[2,8,128], index: 0, kind: input, shape index: {}]   ;;  %s676_s1 = inlined_call_operand.vmem [shape: bf16[8,8], index: 1, kind: input, shape index: {}]   ;;  %s677_s2 = inlined_call_operand.vmem [shape: f32[8,1], index: 2, kind: input, shape index: {}]   ;;  %s678_s3 = inlined_call_operand.vmem [shape: f32[2,8,128], index: 3, kind: output, shape index: {0}]   ;;  %s679_s4 = inlined_call_operand.vmem [shape: f32[2,8,1], index: 4, kind: output, shape index: {1}]   ;;  %s680_s5 = inlined_call_operand.vmem [shape: f32[2,8,1], index: 5, kind: output, shape index: {2}]  }
   0x1   :  { %s614_s20 = smov 0  }
   0x2 LB: > { %s28_s21 = sadd.s32 1, %s571_s19  ;;  %p507_p0 = scmp.ge.s32.totalorder %s575_s20, 1  ;;  %s575_s20 = sphi %s614_s20, %s16_s20   ;;  %s571_s19 = sphi %s612_s19, %s682_s19   ;;  %s567_s18 = sphi %s610_s18, %s681_s18  }
   0x3   : > { %p30_p1 = scmp.ge.s32.totalorder %s28_s21, 2  ;;  %p210_p2 = scmp.lt.s32.totalorder %s575_s20, 3 }
   0x5   : > { %s684_s21 = smov (%p30_p1, %s28_s21), 0  ;;  %p211_p3 = pnand %p507_p0, %p210_p2 }
   0x6   : > { %p250_p4 = scmp.lt.s32.totalorder (!%p211_p3), %s567_s18, 1  ;;  %v273_v0 = vld [vmem:[%s677_s2] sm:$0xff] (!%p211_p3)  ;;  %v577_v1 = vmov (!%p211_p3), 0.0   ;;  %vm578_vm0 = vmmov (!%p211_p3), 0   ;;  %v579_v2 = vmov (!%p211_p3), 0   ;;  %vm334_vm1 = vcmask (!%p211_p3), 7168  }
   0x7   : > { %214 = sbr.rel (%p211_p3) target bundleno = 410 (0x19a), region = 32  ;;  %517 = vmatprep.subr.bf16.mxu0 (!%p211_p3), %v577_v1  ;;  %519 = vmatprep.mubr.msk.bf16.mxu0 (!%p211_p3), %vm578_vm0, %v577_v1  ;;  %vm285_vm2 = vcmask (!%p211_p3), 1043456   ;;  %v274_v5 = vld [vmem:[%s676_s1] sm:$0xf] (!%p211_p3)  ;;  %vm281_vm3 = vcmask (!%p211_p3), 64512   ;;  %v356_v19 = vmul.f32 (!%p211_p3), %v273_v0, %v273_v0  ;;  %v353_v20 = vmul.f32 (!%p211_p3), 64.0, %v273_v0 }
   0x8   : > { %550 = vset.pattern.permute.xlu0 (!%p211_p3), %v579_v2 }
   0x9   : > { %278 = vperm.xlu0 (!%p211_p3), %550, %v273_v0   ;;  %v357_v21 = vmul.f32 (!%p211_p3), 64.0, %v356_v19 }
   0xe   : > { %s686_s18 = smov (!%p250_p4, %s567_s18), 1 }
   0xf   : > { %s508_s24 = sshll.u32 %s686_s18, 2  ;;  %s509_s25 = sshll.u32 %s686_s18, 3 }
  0x10   : > { %s256_s28 = scalar_lea.vmem %s675_s0, %s508_s24  ;;  %s637_s6 = scalar_lea.vmem %s679_s4, %s509_s25 }
  0x11   : > { %s642_s9 = scalar_lea.vmem %s680_s5, %s509_s25  ;;  %v275_v3 = vld [vmem:[%s256_s28] sm:$0xf]  ;;  %335 = vst.msk [vmem:[%s637_s6] sm:$0xff] %vm334_vm1, %v577_v1  ;;  %s263_s14 = scalar_lea.vmem %s678_s3, %s509_s25 }
  0x12   : > { %v287_v4 = vsel %vm285_vm2, %v275_v3, 0  ;;  %336 = vst.msk [vmem:[%s642_s9] sm:$0xff] %vm334_vm1, %v577_v1 }
  0x13   : > { %518 = vmatpush3.bf16.msra.mxu0 %v287_v4 }
  0x16   : > { %520 = vmatmul.mubr.msk.bf16.vlgmr.msra.gmra.mrb[0].mxu0 %vm281_vm3, %v274_v5 }
  0x18   : > { %v337_v13 = vld [vmem:[%s637_s6] sm:$0xff] }
  0x19   : > { %v343_v15 = vld [vmem:[%s642_s9] sm:$0xff] }
  0x88   : > { %v279_v6 = vpop.permute.xlu0 %278 }
  0xe9   : > { %v323_v7 = vpop.f32.mrb[0].mxu0 }
  0xea   : > { %v324_v8 = vadd.f32 %v323_v7, %v279_v6  ;;  %v521_v9 = vpop.f32.mrb[1].mxu0 }
  0xeb   : > { %v326_v10 = vpop.f32.mrb[2].mxu0 }
  0xec   : > { %329 = vst [vmem:[%s263_s14] sm:$0xff] %v324_v8  ;;  %338 = vadd.xlane.f32.xlu0 %v324_v8  ;;  %v522_v11 = vpop.f32.mrb[3].mxu0  ;;  %v344_v12 = vmul.f32 %v324_v8, %v324_v8 }
  0xee   : > { %345 = vadd.xlane.f32.xlu1 %v344_v12 }
 0x179   : > { %v339_v14 = vpop.xlane.xlu0 %338 }
 0x17a   : > { %v340_v16 = vadd.f32 %v339_v14, %v337_v13 }
 0x17b   : > { %v346_v17 = vpop.xlane.xlu1 %345 }
 0x17c   : > { %342 = vst.msk [vmem:[%s637_s6] sm:$0xff] %vm334_vm1, %v340_v16  ;;  %v347_v18 = vadd.f32 %v346_v17, %v343_v15 }
 0x17e   : > { %348 = vst.msk [vmem:[%s642_s9] sm:$0xff] %vm334_vm1, %v347_v18 }
 0x183   : > { %v352_v22 = vld [vmem:[%s637_s6] sm:$0xff] }
 0x184   : > { %v354_v23 = vsub.f32 %v352_v22, %v353_v20 }
 0x185   : > { %v355_v24 = vld [vmem:[%s642_s9] sm:$0xff] }
 0x186   : > { %v359_v25 = vmul.f32 0.015625, %v354_v23  ;;  %v358_v26 = vsub.f32 %v355_v24, %v357_v21 }
 0x188   : > { %v361_v27 = vmul.f32 %v359_v25, %v359_v25  ;;  %363 = vst.msk [vmem:[%s637_s6] sm:$0xff] %vm334_vm1, %v359_v25  ;;  %v360_v28 = vmul.f32 0.015625, %v358_v26 }
 0x18a   : > { %v362_v29 = vsub.f32 %v360_v28, %v361_v27 }
 0x18c   : > { %v364_v30 = vadd.f32 1e-05, %v362_v29 }
 0x18e   : > { %551 = vrsqrt.f32 %v364_v30 }
 0x198   : > { %v552_v31 = vpop.eup %551 }
 0x199   : > { %366 = vst.msk [vmem:[%s642_s9] sm:$0xff] %vm334_vm1, %v552_v31 }
 0x19a PF: > { %s16_s20 = sadd.s32 1, %s575_s20   ;;  %s681_s18 = smov %s571_s19 }
 0x19b   : > { %p13_p5 = scmp.ge.s32.totalorder %s16_s20, 4   ;;  %s682_s19 = smov %s684_s21 }
 0x19d   :  { %15 = sbr.rel (!%p13_p5) target bundleno = 2 (0x2), region = 94 }

// kernel: unet_res_block.9
= control target key start
LH: loop header
LB: loop body
LE: loop exit
PB: predicated region body
PF: predicated region fallthrough
CT: control target
= control target key end

     0   :  { %s793_s13 = smov 0   ;;  %s795_s14 = smov 0   ;;  %s862_s0 = inlined_call_operand.vmem [shape: f32[2,8,128], index: 0, kind: input, shape index: {}]   ;;  %s863_s1 = inlined_call_operand.vmem [shape: f32[2,8,1], index: 1, kind: input, shape index: {}]   ;;  %s864_s2 = inlined_call_operand.vmem [shape: f32[2,8,1], index: 2, kind: input, shape index: {}]   ;;  %s865_s3 = inlined_call_operand.vmem [shape: f32[8,1], index: 3, kind: input, shape index: {}]   ;;  %s866_s4 = inlined_call_operand.vmem [shape: f32[8,1], index: 4, kind: input, shape index: {}]   ;;  %s867_s5 = inlined_call_operand.vmem [shape: f32[2,8,128], index: 5, kind: input, shape index: {}]   ;;  %s868_s6 = inlined_call_operand.vmem [shape: f32[2,8,1], index: 6, kind: input, shape index: {}]   ;;  %s869_s7 = inlined_call_operand.vmem [shape: f32[2,8,1], index: 7, kind: input, shape index: {}]   ;;  %s870_s8 = inlined_call_operand.vmem [shape: f32[8,1], index: 8, kind: input, shape index: {}]   ;;  %s871_s9 = inlined_call_operand.vmem [shape: f32[8,1], index: 9, kind: input, shape index: {}]   ;;  %s872_s10 = inlined_call_operand.vmem [shape: f32[2,8,128], index: 10, kind: output, shape index: {}]  }
   0x1   :  { %s797_s15 = smov 0  }
   0x2 LB: > { %s32_s16 = sadd.s32 1, %s731_s14  ;;  %p676_p0 = scmp.ge.s32.totalorder %s735_s15, 1  ;;  %s735_s15 = sphi %s797_s15, %s20_s15   ;;  %s731_s14 = sphi %s795_s14, %s874_s14   ;;  %s727_s13 = sphi %s793_s13, %s873_s13  }
   0x3   : > { %p34_p1 = scmp.ge.s32.totalorder %s32_s16, 2  ;;  %p380_p2 = scmp.lt.s32.totalorder %s735_s15, 3 }
   0x5   : > { %s876_s16 = smov (%p34_p1, %s32_s16), 0  ;;  %p381_p3 = pnand %p676_p0, %p380_p2 }
   0x6   : > { %p445_p4 = scmp.lt.s32.totalorder (!%p381_p3), %s727_s13, 1  ;;  %v737_v0 = vmov (!%p381_p3), 0   ;;  %v491_v1 = vld [vmem:[%s865_s3] sm:$0xff] (!%p381_p3) }
   0x7   : > { %384 = sbr.rel (%p381_p3) target bundleno = 165 (0xa5), region = 60  ;;  %711 = vset.pattern.permute.xlu0 (!%p381_p3), %v737_v0  ;;  %712 = vset.pattern.permute.xlu1 (!%p381_p3), %v737_v0  ;;  %v515_v4 = vld [vmem:[%s870_s8] sm:$0xff] (!%p381_p3) }
   0x8   : > { %v499_v9 = vld [vmem:[%s866_s4] sm:$0xff] (!%p381_p3) }
   0x9   : > { %v523_v10 = vld [vmem:[%s871_s9] sm:$0xff] (!%p381_p3) }
   0xe   : > { %s878_s13 = smov (!%p445_p4, %s727_s13), 1 }
   0xf   : > { %s811_s17 = sshll.u32 %s878_s13, 3 }
  0x10   : > { %s455_s22 = scalar_lea.vmem %s863_s1, %s811_s17  ;;  %s459_s25 = scalar_lea.vmem %s864_s2, %s811_s17 }
  0x11   : > { %v483_v2 = vld [vmem:[%s455_s22] sm:$0xff]  ;;  %s470_s28 = scalar_lea.vmem %s868_s6, %s811_s17  ;;  %s474_s11 = scalar_lea.vmem %s869_s7, %s811_s17 }
  0x12   : > { %v490_v3 = vld [vmem:[%s459_s25] sm:$0xff]  ;;  %486 = vperm.xlu0 %711, %v483_v2   ;;  %s451_s24 = scalar_lea.vmem %s862_s0, %s811_s17  ;;  %s466_s27 = scalar_lea.vmem %s867_s5, %s811_s17 }
  0x13   : > { %v492_v5 = vmul.f32 %v491_v1, %v490_v3  ;;  %v514_v6 = vld [vmem:[%s474_s11] sm:$0xff]  ;;  %s481_s30 = scalar_lea.vmem %s872_s10, %s811_s17 }
  0x14   : > { %v507_v7 = vld [vmem:[%s470_s28] sm:$0xff]  ;;  %v516_v8 = vmul.f32 %v515_v4, %v514_v6 }
  0x15   : > { %495 = vperm.xlu1 %712, %v492_v5   ;;  %v482_v12 = vld [vmem:[%s451_s24] sm:$0xff] }
  0x16   : > { %510 = vperm.xlu0 %711, %v507_v7   ;;  %v506_v14 = vld [vmem:[%s466_s27] sm:$0xff] }
  0x19   : > { %519 = vperm.xlu1 %712, %v516_v8  }
  0x1a   : > { %502 = vperm.xlu0 %711, %v499_v9  }
  0x1d   : > { %526 = vperm.xlu1 %712, %v523_v10  }
  0x91   : > { %v487_v11 = vpop.permute.xlu0 %486 }
  0x92   : > { %v489_v16 = vsub.f32 %v482_v12, %v487_v11 }
  0x94   : > { %v496_v13 = vpop.permute.xlu1 %495 }
  0x95   : > { %v511_v15 = vpop.permute.xlu0 %510  ;;  %v498_v20 = vmul.f32 %v496_v13, %v489_v16 }
  0x96   : > { %v513_v17 = vsub.f32 %v506_v14, %v511_v15 }
  0x98   : > { %v520_v18 = vpop.permute.xlu1 %519 }
  0x99   : > { %v503_v19 = vpop.permute.xlu0 %502  ;;  %v522_v21 = vmul.f32 %v520_v18, %v513_v17 }
  0x9a   : > { %v505_v23 = vadd.f32 %v503_v19, %v498_v20 }
  0x9c   : > { %v527_v22 = vpop.permute.xlu1 %526 }
  0x9d   : > { %v529_v24 = vadd.f32 %v527_v22, %v522_v21 }
  0x9f   : > { %v530_v25 = vadd.f32 %v529_v24, %v505_v23 }
  0xa1   : > { %vm531_vm0 = vcmp.ge.f32.partialorder %v530_v25, 0.0  ;;  %v532_v26 = vmul.f32 0.01, %v530_v25 }
  0xa3   : > { %v533_v27 = vsel %vm531_vm0, %v530_v25, %v532_v26 }
  0xa4   : > { %534 = vst [vmem:[%s481_s30] sm:$0xff] %v533_v27 }
  0xa5 PF: > { %s20_s15 = sadd.s32 1, %s735_s15   ;;  %s873_s13 = smov %s731_s14 }
  0xa6   : > { %p17_p5 = scmp.ge.s32.totalorder %s20_s15, 4   ;;  %s874_s14 = smov %s876_s16 }
  0xa8   :  { %19 = sbr.rel (!%p17_p5) target bundleno = 2 (0x2), region = 105 }

</bundles_post_ra>
